<compile_context>
chip_gen: v7x
topology: tpu7x:2x2x1
jax: 0.10.0
libtpu: 0.0.40
codegen_flags: <defaults>
</compile_context>

<pallas_src>
import functools

import jax
import jax.numpy as jnp
from jax.experimental import pallas as pl
from jax.experimental.pallas import tpu as pltpu


_LANE = 128
_BF16_PACK = 16          # bf16 packs 16 sublanes per vreg
_MIN_MEGACORE_ROWS = 256  # split batch into >=2 tiles once both v7x TCs can be fed


def _round_up(n, m):
    return ((n + m - 1) // m) * m


def _pad2(x, rows, cols):
    return jnp.pad(x, ((0, rows - x.shape[0]), (0, cols - x.shape[1])))


def erc_forward_kernel(
    n_classes, e_p,
    # batch-tiled inputs
    x_text_ref, x_vis_ref, x_aud_ref,
    # VMEM-resident weights (constant index_map)
    wt_ref, bt_ref, wv_ref, bv_ref, wa_ref, ba_ref,
    w1_ref, b1_ref, w2_ref, b2_ref, wl_ref, bl_ref,
    # outputs (lane-dense, padded)
    probs_ref, logits_ref, hidden_ref,
):
    f32 = jnp.float32
    bf16 = jnp.bfloat16

    # --- modality embeddings: bf16 MXU inputs, f32 accumulation, f32 bias ---
    yt = jnp.dot(x_text_ref[...], wt_ref[...], preferred_element_type=f32) + bt_ref[...]
    yv = jnp.dot(x_vis_ref[...],  wv_ref[...], preferred_element_type=f32) + bv_ref[...]
    ya = jnp.dot(x_aud_ref[...],  wa_ref[...], preferred_element_type=f32) + ba_ref[...]

    # --- concat fusion + feedforward layer 1 without materializing the concat:
    #     accumulate partial products against static row-slices of stacked w1.
    h1 = (jnp.dot(yt.astype(bf16), w1_ref[0:e_p, :], preferred_element_type=f32)
          + jnp.dot(yv.astype(bf16), w1_ref[e_p:2 * e_p, :], preferred_element_type=f32)
          + jnp.dot(ya.astype(bf16), w1_ref[2 * e_p:3 * e_p, :], preferred_element_type=f32)
          + b1_ref[...])
    h1 = jnp.maximum(h1, 0.0)

    # --- feedforward layer 2 (Linear + ReLU) ---
    h2 = jnp.dot(h1.astype(bf16), w2_ref[...], preferred_element_type=f32) + b2_ref[...]
    h2 = jnp.maximum(h2, 0.0)

    # --- L2 normalize over features (torch F.normalize, eps=1e-12), EUP rsqrt ---
    ssq = jnp.sum(h2 * h2, axis=1, keepdims=True)
    hn = h2 * jax.lax.rsqrt(jnp.maximum(ssq, 1e-24))

    # --- classifier logits (lane-dense padded) + masked softmax(dim=1) ---
    logits = jnp.dot(hn.astype(bf16), wl_ref[...], preferred_element_type=f32) + bl_ref[...]
    col = jax.lax.broadcasted_iota(jnp.int32, logits.shape, dimension=1)
    masked = jnp.where(col < n_classes, logits, -1e30)  # kill padded class lanes
    m = jnp.max(masked, axis=1, keepdims=True)
    e = jnp.exp(masked - m)
    denom = jnp.sum(e, axis=1, keepdims=True)
    probs = e * pl.reciprocal(denom)                    # exact: rows sum to 1

    probs_ref[...] = probs
    logits_ref[...] = logits.astype(logits_ref.dtype)   # bf16 writeback
    hidden_ref[...] = hn.astype(hidden_ref.dtype)       # bf16 writeback


def prepare_erc_params(params):
    """One-time weight prep: pad lane-dense, cast to bf16, stack the FF1 blocks.

    Hoisted out of the forward so repeated calls do not re-run ~12 pad / cast /
    concat XLA passes over the full weight set on every step.
    """
    f32, bf16 = jnp.float32, jnp.bfloat16

    d_text, emb = params["wt"].shape
    d_vis = params["wv"].shape[0]
    d_aud = params["wa"].shape[0]
    h1 = params["w1t"].shape[1]
    h2 = params["w2"].shape[1]
    n_classes = params["wl"].shape[1]

    dt_p = _round_up(d_text, _LANE)
    dv_p = _round_up(d_vis, _LANE)
    da_p = _round_up(d_aud, _LANE)
    e_p = _round_up(emb, _LANE)
    h1_p = _round_up(h1, _LANE)
    h2_p = _round_up(h2, _LANE)
    c_p = _round_up(n_classes, _LANE)

    weights = (
        _pad2(params["wt"], dt_p, e_p).astype(bf16),
        _pad2(params["bt"], 1, e_p).astype(f32),
        _pad2(params["wv"], dv_p, e_p).astype(bf16),
        _pad2(params["bv"], 1, e_p).astype(f32),
        _pad2(params["wa"], da_p, e_p).astype(bf16),
        _pad2(params["ba"], 1, e_p).astype(f32),
        jnp.concatenate([_pad2(params["w1t"], e_p, h1_p),
                         _pad2(params["w1v"], e_p, h1_p),
                         _pad2(params["w1a"], e_p, h1_p)], axis=0).astype(bf16),
        _pad2(params["b1"], 1, h1_p).astype(f32),
        _pad2(params["w2"], h1_p, h2_p).astype(bf16),
        _pad2(params["b2"], 1, h2_p).astype(f32),
        _pad2(params["wl"], h2_p, c_p).astype(bf16),
        _pad2(params["bl"], 1, c_p).astype(f32),
    )
    meta = dict(dt_p=dt_p, dv_p=dv_p, da_p=da_p, e_p=e_p,
                h1_p=h1_p, h2_p=h2_p, c_p=c_p,
                h2=h2, n_classes=n_classes)
    return weights, meta


def erc_model_forward(x_text, x_visual, x_audio, weights, meta, *, batch_tile=512):
    """Pads inputs lane-dense, tiles the batch on a grid, calls the fused kernel."""
    f32, bf16 = jnp.float32, jnp.bfloat16

    B = x_text.shape[0]
    x_vis = x_visual.reshape(B, -1)

    dt_p, dv_p, da_p = meta["dt_p"], meta["dv_p"], meta["da_p"]
    e_p, h1_p, h2_p, c_p = meta["e_p"], meta["h1_p"], meta["h2_p"], meta["c_p"]
    n_classes, h2 = meta["n_classes"], meta["h2"]

    # Batch tile: big enough to amortize per-grid-step overhead, rounded to the
    # bf16 sublane-pack (16); once there is enough work for both v7x TCs, keep
    # at least 2 grid steps so the second core is not idle.
    b16 = _round_up(max(B, 1), _BF16_PACK)
    tb = min(batch_tile, b16)
    if b16 >= 2 * _MIN_MEGACORE_ROWS:
        tb = min(tb, _round_up((b16 + 1) // 2, _BF16_PACK))
    b_p = _round_up(B, tb)

    # Pad + cast inputs (bf16 halves input DMA into the kernel).
    xt = _pad2(x_text, b_p, dt_p).astype(bf16)
    xv = _pad2(x_vis, b_p, dv_p).astype(bf16)
    xa = _pad2(x_audio, b_p, da_p).astype(bf16)

    grid = (b_p // tb,)

    def batch_spec(cols):
        return pl.BlockSpec((tb, cols), lambda i: (i, 0))

    # Explicit VMEM budget: weights (ideally single-buffered) + double-buffered
    # I/O tiles + f32 intermediates + slack.  Floor at 32 MiB (above the 16 MiB
    # v5e / 32 MiB v6e-v7x scoped defaults), cap at 128 MiB.
    weight_bytes = sum(int(w.size) * w.dtype.itemsize for w in weights)
    io_tile_bytes = tb * ((dt_p + dv_p + da_p) * 2 + c_p * 4 + (c_p + h2_p) * 2)
    interm_bytes = tb * (3 * e_p + h1_p + 2 * h2_p + 3 * c_p) * 4
    vmem_demand = 2 * weight_bytes + 2 * io_tile_bytes + interm_bytes + (4 << 20)
    vmem_limit = int(min(max(vmem_demand, 32 << 20), 128 << 20))

    flops = 2 * b_p * (dt_p * e_p + dv_p * e_p + da_p * e_p
                       + 3 * e_p * h1_p + h1_p * h2_p + h2_p * c_p)
    bytes_accessed = (sum(int(a.size) * a.dtype.itemsize for a in (xt, xv, xa))
                      + weight_bytes + b_p * (c_p * 4 + (c_p + h2_p) * 2))
    cost = pl.CostEstimate(flops=int(flops),
                           transcendentals=int(b_p * (c_p + 2)),
                           bytes_accessed=int(bytes_accessed))

    out_shape = (
        jax.ShapeDtypeStruct((b_p, c_p), f32),    # probs (padded classes)
        jax.ShapeDtypeStruct((b_p, c_p), bf16),   # logits (bf16 writeback)
        jax.ShapeDtypeStruct((b_p, h2_p), bf16),  # hidden states (bf16 writeback)
    )
    out_specs = (batch_spec(c_p), batch_spec(c_p), batch_spec(h2_p))

    kernel = functools.partial(erc_forward_kernel, n_classes, e_p)

    def run(weight_pipeline_mode):
        def resident_spec(shape):
            if weight_pipeline_mode is None:
                return pl.BlockSpec(shape, lambda i: (0, 0))
            # Constant index_map => block never re-fetched; 1 buffer saves VMEM
            # (matters once realistic visual weights appear, esp. on v7x).
            return pl.BlockSpec(shape, lambda i: (0, 0),
                                pipeline_mode=weight_pipeline_mode)

        in_specs = ([batch_spec(dt_p), batch_spec(dv_p), batch_spec(da_p)]
                    + [resident_spec(w.shape) for w in weights])
        return pl.pallas_call(
            kernel,
            grid=grid,
            in_specs=in_specs,
            out_specs=out_specs,
            out_shape=out_shape,
            compiler_params=pltpu.CompilerParams(
                dimension_semantics=("parallel",),  # shard batch tiles across TCs
                vmem_limit_bytes=vmem_limit),
            cost_estimate=cost,
        )(xt, xv, xa, *weights)

    buffered_cls = getattr(pl, "Buffered", None)
    single_buffer = buffered_cls(1) if buffered_cls is not None else None
    try:
        probs_p, logits_p, hidden_p = run(single_buffer)
    except Exception:
        if single_buffer is None:
            raise
        # Fallback for jax builds that reject pipeline_mode=Buffered(1) on
        # pallas_call block specs; double-buffered weights are still correct.
        probs_p, logits_p, hidden_p = run(None)

    # Strip padding back to the logical shapes (upcast bf16 writebacks to f32).
    return (probs_p[:B, :n_classes],
            logits_p[:B, :n_classes].astype(f32),
            hidden_p[:B, :h2].astype(f32))


def _init_params(key, d_text, d_vis, d_aud, emb, h1, h2, n_classes):
    ks = jax.random.split(key, 16)
    s = 0.05

    def w(k, shape):
        return jax.random.normal(k, shape, dtype=jnp.float32) * s

    return {
        "wt": w(ks[0], (d_text, emb)), "bt": w(ks[1], (1, emb)),
        "wv": w(ks[2], (d_vis, emb)),  "bv": w(ks[3], (1, emb)),
        "wa": w(ks[4], (d_aud, emb)),  "ba": w(ks[5], (1, emb)),
        "w1t": w(ks[6], (emb, h1)),
        "w1v": w(ks[7], (emb, h1)),
        "w1a": w(ks[8], (emb, h1)),
        "b1": w(ks[9], (1, h1)),
        "w2": w(ks[10], (h1, h2)), "b2": w(ks[11], (1, h2)),
        "wl": w(ks[12], (h2, n_classes)), "bl": w(ks[13], (1, n_classes)),
    }


def _reference_forward(x_text, x_visual, x_audio, p):
    """Pure-JAX f32 reference mirroring the PyTorch forward semantics."""
    B = x_text.shape[0]
    xv = x_visual.reshape(B, -1)
    yt = x_text @ p["wt"] + p["bt"]
    yv = xv @ p["wv"] + p["bv"]
    ya = x_audio @ p["wa"] + p["ba"]
    fused = jnp.concatenate([yt, yv, ya], axis=-1)
    w1 = jnp.concatenate([p["w1t"], p["w1v"], p["w1a"]], axis=0)
    h1 = jnp.maximum(fused @ w1 + p["b1"], 0.0)
    h2 = jnp.maximum(h1 @ p["w2"] + p["b2"], 0.0)
    nrm = jnp.sqrt(jnp.sum(h2 * h2, axis=1, keepdims=True))
    hn = h2 / jnp.maximum(nrm, 1e-12)
    logits = hn @ p["wl"] + p["bl"]
    probs = jax.nn.softmax(logits, axis=1)
    return probs, logits, hn


if __name__ == "__main__":
    # Small shapes consistent with the forward pass.
    B = 2
    D_TEXT, D_AUD = 32, 64
    C_IMG, H_IMG, W_IMG = 3, 16, 16
    D_VIS = C_IMG * H_IMG * W_IMG
    EMB, H1, H2 = 32, 64, 32
    N_CLASSES = 7  # MELD emotion classes

    key = jax.random.PRNGKey(0)
    k_in, k_p = jax.random.split(key)
    k1, k2, k3 = jax.random.split(k_in, 3)

    x_text = jax.random.normal(k1, (B, D_TEXT), dtype=jnp.float32)
    x_visual = jax.random.normal(k2, (B, C_IMG, H_IMG, W_IMG), dtype=jnp.float32)
    x_audio = jax.random.normal(k3, (B, D_AUD), dtype=jnp.float32)

    params = _init_params(k_p, D_TEXT, D_VIS, D_AUD, EMB, H1, H2, N_CLASSES)

    # One-time weight prep (pad / bf16 cast / FF1 stack), hoisted out of forward.
    weights, meta = prepare_erc_params(params)
    weights = jax.block_until_ready(weights)

    probs, logits, hidden = erc_model_forward(x_text, x_visual, x_audio, weights, meta)
    jax.block_until_ready((probs, logits, hidden))

    # Correctness check against pure-JAX f32 reference (kernel matmuls are bf16
    # and hidden/logits are written back as bf16, so tolerances are loosened).
    r_probs, r_logits, r_hidden = _reference_forward(x_text, x_visual, x_audio, params)
    assert probs.shape == (B, N_CLASSES) and logits.shape == (B, N_CLASSES)
    assert hidden.shape == (B, H2)
    assert jnp.allclose(probs, r_probs, atol=2e-2), "probs mismatch"
    assert jnp.allclose(logits, r_logits, atol=2e-2), "logits mismatch"
    assert jnp.allclose(hidden, r_hidden, atol=3e-2), "hidden mismatch"
    assert jnp.allclose(jnp.sum(probs, axis=1), 1.0, atol=1e-3), "softmax rows must sum to 1"

    print("KERNEL_OK")
</pallas_src>

<mosaic_0001>
module attributes {stable_mosaic.version = 11 : i64} {
  func.func @erc_forward_kernel(%arg0: i32, %arg1: memref<16x128xbf16, #tpu.memory_space<vmem>>, %arg2: memref<16x768xbf16, #tpu.memory_space<vmem>>, %arg3: memref<16x128xbf16, #tpu.memory_space<vmem>>, %arg4: memref<128x128xbf16, #tpu.memory_space<vmem>>, %arg5: memref<1x128xf32, #tpu.memory_space<vmem>>, %arg6: memref<768x128xbf16, #tpu.memory_space<vmem>>, %arg7: memref<1x128xf32, #tpu.memory_space<vmem>>, %arg8: memref<128x128xbf16, #tpu.memory_space<vmem>>, %arg9: memref<1x128xf32, #tpu.memory_space<vmem>>, %arg10: memref<384x128xbf16, #tpu.memory_space<vmem>>, %arg11: memref<1x128xf32, #tpu.memory_space<vmem>>, %arg12: memref<128x128xbf16, #tpu.memory_space<vmem>>, %arg13: memref<1x128xf32, #tpu.memory_space<vmem>>, %arg14: memref<128x128xbf16, #tpu.memory_space<vmem>>, %arg15: memref<1x128xf32, #tpu.memory_space<vmem>>, %arg16: memref<16x128xf32, #tpu.memory_space<vmem>>, %arg17: memref<16x128xbf16, #tpu.memory_space<vmem>>, %arg18: memref<16x128xbf16, #tpu.memory_space<vmem>>) attributes {dimension_semantics = [#tpu.dimension_semantics<parallel>], iteration_bounds = array<i64: 1>, scalar_prefetch = 0 : i64, scratch_operands = 0 : i64, tpu.core_type = #tpu.core_type<tc>, window_params = [{transform_indices = @transform_0, window_bounds = array<i64: 16, 128>}, {transform_indices = @transform_1, window_bounds = array<i64: 16, 768>}, {transform_indices = @transform_2, window_bounds = array<i64: 16, 128>}, {pipeline_mode = #tpu.pipeline_mode<synchronous>, transform_indices = @transform_3, window_bounds = array<i64: 128, 128>}, {pipeline_mode = #tpu.pipeline_mode<synchronous>, transform_indices = @transform_4, window_bounds = array<i64: 1, 128>}, {pipeline_mode = #tpu.pipeline_mode<synchronous>, transform_indices = @transform_5, window_bounds = array<i64: 768, 128>}, {pipeline_mode = #tpu.pipeline_mode<synchronous>, transform_indices = @transform_6, window_bounds = array<i64: 1, 128>}, {pipeline_mode = #tpu.pipeline_mode<synchronous>, transform_indices = @transform_7, window_bounds = array<i64: 128, 128>}, {pipeline_mode = #tpu.pipeline_mode<synchronous>, transform_indices = @transform_8, window_bounds = array<i64: 1, 128>}, {pipeline_mode = #tpu.pipeline_mode<synchronous>, transform_indices = @transform_9, window_bounds = array<i64: 384, 128>}, {pipeline_mode = #tpu.pipeline_mode<synchronous>, transform_indices = @transform_10, window_bounds = array<i64: 1, 128>}, {pipeline_mode = #tpu.pipeline_mode<synchronous>, transform_indices = @transform_11, window_bounds = array<i64: 128, 128>}, {pipeline_mode = #tpu.pipeline_mode<synchronous>, transform_indices = @transform_12, window_bounds = array<i64: 1, 128>}, {pipeline_mode = #tpu.pipeline_mode<synchronous>, transform_indices = @transform_13, window_bounds = array<i64: 128, 128>}, {pipeline_mode = #tpu.pipeline_mode<synchronous>, transform_indices = @transform_14, window_bounds = array<i64: 1, 128>}, {transform_indices = @transform_15, window_bounds = array<i64: 16, 128>}, {transform_indices = @transform_16, window_bounds = array<i64: 16, 128>}, {transform_indices = @transform_17, window_bounds = array<i64: 16, 128>}]} {
    %c0 = arith.constant 0 : index
    %c0_0 = arith.constant 0 : index
    %0 = vector.load %arg1[%c0, %c0_0] : memref<16x128xbf16, #tpu.memory_space<vmem>>, vector<16x128xbf16>
    %c0_1 = arith.constant 0 : index
    %c0_2 = arith.constant 0 : index
    %1 = vector.load %arg4[%c0_1, %c0_2] : memref<128x128xbf16, #tpu.memory_space<vmem>>, vector<128x128xbf16>
    %cst = arith.constant dense<0.000000e+00> : vector<16x128xf32>
    %2 = tpu.matmul %0, %1, %cst {dimension_numbers = #tpu.dot_dimension_numbers<[1], [0], [0], [1], [0, 0, 1, 1], [], []>} : vector<16x128xbf16>, vector<128x128xbf16>, vector<16x128xf32> -> vector<16x128xf32>
    %c0_3 = arith.constant 0 : index
    %c0_4 = arith.constant 0 : index
    %3 = vector.load %arg5[%c0_3, %c0_4] : memref<1x128xf32, #tpu.memory_space<vmem>>, vector<1x128xf32>
    %4 = vector.broadcast %3 : vector<1x128xf32> to vector<16x128xf32>
    %5 = arith.addf %2, %4 : vector<16x128xf32>
    %c0_5 = arith.constant 0 : index
    %c0_6 = arith.constant 0 : index
    %6 = vector.load %arg2[%c0_5, %c0_6] : memref<16x768xbf16, #tpu.memory_space<vmem>>, vector<16x768xbf16>
    %c0_7 = arith.constant 0 : index
    %c0_8 = arith.constant 0 : index
    %7 = vector.load %arg6[%c0_7, %c0_8] : memref<768x128xbf16, #tpu.memory_space<vmem>>, vector<768x128xbf16>
    %cst_9 = arith.constant dense<0.000000e+00> : vector<16x128xf32>
    %8 = tpu.matmul %6, %7, %cst_9 {dimension_numbers = #tpu.dot_dimension_numbers<[1], [0], [0], [1], [0, 0, 1, 1], [], []>} : vector<16x768xbf16>, vector<768x128xbf16>, vector<16x128xf32> -> vector<16x128xf32>
    %c0_10 = arith.constant 0 : index
    %c0_11 = arith.constant 0 : index
    %9 = vector.load %arg7[%c0_10, %c0_11] : memref<1x128xf32, #tpu.memory_space<vmem>>, vector<1x128xf32>
    %10 = vector.broadcast %9 : vector<1x128xf32> to vector<16x128xf32>
    %11 = arith.addf %8, %10 : vector<16x128xf32>
    %c0_12 = arith.constant 0 : index
    %c0_13 = arith.constant 0 : index
    %12 = vector.load %arg3[%c0_12, %c0_13] : memref<16x128xbf16, #tpu.memory_space<vmem>>, vector<16x128xbf16>
    %c0_14 = arith.constant 0 : index
    %c0_15 = arith.constant 0 : index
    %13 = vector.load %arg8[%c0_14, %c0_15] : memref<128x128xbf16, #tpu.memory_space<vmem>>, vector<128x128xbf16>
    %cst_16 = arith.constant dense<0.000000e+00> : vector<16x128xf32>
    %14 = tpu.matmul %12, %13, %cst_16 {dimension_numbers = #tpu.dot_dimension_numbers<[1], [0], [0], [1], [0, 0, 1, 1], [], []>} : vector<16x128xbf16>, vector<128x128xbf16>, vector<16x128xf32> -> vector<16x128xf32>
    %c0_17 = arith.constant 0 : index
    %c0_18 = arith.constant 0 : index
    %15 = vector.load %arg9[%c0_17, %c0_18] : memref<1x128xf32, #tpu.memory_space<vmem>>, vector<1x128xf32>
    %16 = vector.broadcast %15 : vector<1x128xf32> to vector<16x128xf32>
    %17 = arith.addf %14, %16 : vector<16x128xf32>
    %18 = arith.truncf %5 : vector<16x128xf32> to vector<16x128xbf16>
    %c0_19 = arith.constant 0 : index
    %c0_20 = arith.constant 0 : index
    %19 = vector.load %arg10[%c0_19, %c0_20] : memref<384x128xbf16, #tpu.memory_space<vmem>>, vector<128x128xbf16>
    %cst_21 = arith.constant dense<0.000000e+00> : vector<16x128xf32>
    %20 = tpu.matmul %18, %19, %cst_21 {dimension_numbers = #tpu.dot_dimension_numbers<[1], [0], [0], [1], [0, 0, 1, 1], [], []>} : vector<16x128xbf16>, vector<128x128xbf16>, vector<16x128xf32> -> vector<16x128xf32>
    %21 = arith.truncf %11 : vector<16x128xf32> to vector<16x128xbf16>
    %c128 = arith.constant 128 : index
    %c0_22 = arith.constant 0 : index
    %22 = vector.load %arg10[%c128, %c0_22] : memref<384x128xbf16, #tpu.memory_space<vmem>>, vector<128x128xbf16>
    %cst_23 = arith.constant dense<0.000000e+00> : vector<16x128xf32>
    %23 = tpu.matmul %21, %22, %cst_23 {dimension_numbers = #tpu.dot_dimension_numbers<[1], [0], [0], [1], [0, 0, 1, 1], [], []>} : vector<16x128xbf16>, vector<128x128xbf16>, vector<16x128xf32> -> vector<16x128xf32>
    %24 = arith.addf %20, %23 : vector<16x128xf32>
    %25 = arith.truncf %17 : vector<16x128xf32> to vector<16x128xbf16>
    %c256 = arith.constant 256 : index
    %c0_24 = arith.constant 0 : index
    %26 = vector.load %arg10[%c256, %c0_24] : memref<384x128xbf16, #tpu.memory_space<vmem>>, vector<128x128xbf16>
    %cst_25 = arith.constant dense<0.000000e+00> : vector<16x128xf32>
    %27 = tpu.matmul %25, %26, %cst_25 {dimension_numbers = #tpu.dot_dimension_numbers<[1], [0], [0], [1], [0, 0, 1, 1], [], []>} : vector<16x128xbf16>, vector<128x128xbf16>, vector<16x128xf32> -> vector<16x128xf32>
    %28 = arith.addf %24, %27 : vector<16x128xf32>
    %c0_26 = arith.constant 0 : index
    %c0_27 = arith.constant 0 : index
    %29 = vector.load %arg11[%c0_26, %c0_27] : memref<1x128xf32, #tpu.memory_space<vmem>>, vector<1x128xf32>
    %30 = vector.broadcast %29 : vector<1x128xf32> to vector<16x128xf32>
    %31 = arith.addf %28, %30 : vector<16x128xf32>
    %cst_28 = arith.constant 0.000000e+00 : f32
    %32 = vector.broadcast %cst_28 : f32 to vector<16x128xf32>
    %33 = arith.maximumf %31, %32 : vector<16x128xf32>
    %34 = arith.truncf %33 : vector<16x128xf32> to vector<16x128xbf16>
    %c0_29 = arith.constant 0 : index
    %c0_30 = arith.constant 0 : index
    %35 = vector.load %arg12[%c0_29, %c0_30] : memref<128x128xbf16, #tpu.memory_space<vmem>>, vector<128x128xbf16>
    %cst_31 = arith.constant dense<0.000000e+00> : vector<16x128xf32>
    %36 = tpu.matmul %34, %35, %cst_31 {dimension_numbers = #tpu.dot_dimension_numbers<[1], [0], [0], [1], [0, 0, 1, 1], [], []>} : vector<16x128xbf16>, vector<128x128xbf16>, vector<16x128xf32> -> vector<16x128xf32>
    %c0_32 = arith.constant 0 : index
    %c0_33 = arith.constant 0 : index
    %37 = vector.load %arg13[%c0_32, %c0_33] : memref<1x128xf32, #tpu.memory_space<vmem>>, vector<1x128xf32>
    %38 = vector.broadcast %37 : vector<1x128xf32> to vector<16x128xf32>
    %39 = arith.addf %36, %38 : vector<16x128xf32>
    %cst_34 = arith.constant 0.000000e+00 : f32
    %40 = vector.broadcast %cst_34 : f32 to vector<16x128xf32>
    %41 = arith.maximumf %39, %40 : vector<16x128xf32>
    %42 = arith.mulf %41, %41 : vector<16x128xf32>
    %cst_35 = arith.constant dense<0.000000e+00> : vector<16xf32>
    %43 = vector.multi_reduction <add>, %42, %cst_35 [1] : vector<16x128xf32> to vector<16xf32>
    %44 = vector.shape_cast %43 : vector<16xf32> to vector<16x1xf32>
    %cst_36 = arith.constant 1.000000e-24 : f32
    %45 = vector.broadcast %cst_36 : f32 to vector<16x1xf32>
    %46 = arith.maximumf %44, %45 : vector<16x1xf32>
    %47 = math.rsqrt %46 : vector<16x1xf32>
    %48 = vector.broadcast %47 : vector<16x1xf32> to vector<16x128xf32>
    %49 = arith.mulf %41, %48 : vector<16x128xf32>
    %50 = arith.truncf %49 : vector<16x128xf32> to vector<16x128xbf16>
    %c0_37 = arith.constant 0 : index
    %c0_38 = arith.constant 0 : index
    %51 = vector.load %arg14[%c0_37, %c0_38] : memref<128x128xbf16, #tpu.memory_space<vmem>>, vector<128x128xbf16>
    %cst_39 = arith.constant dense<0.000000e+00> : vector<16x128xf32>
    %52 = tpu.matmul %50, %51, %cst_39 {dimension_numbers = #tpu.dot_dimension_numbers<[1], [0], [0], [1], [0, 0, 1, 1], [], []>} : vector<16x128xbf16>, vector<128x128xbf16>, vector<16x128xf32> -> vector<16x128xf32>
    %c0_40 = arith.constant 0 : index
    %c0_41 = arith.constant 0 : index
    %53 = vector.load %arg15[%c0_40, %c0_41] : memref<1x128xf32, #tpu.memory_space<vmem>>, vector<1x128xf32>
    %54 = vector.broadcast %53 : vector<1x128xf32> to vector<16x128xf32>
    %55 = arith.addf %52, %54 : vector<16x128xf32>
    %56 = tpu.iota {dimensions = array<i32: 1>} : vector<16x128xi32>
    %c7_i32 = arith.constant 7 : i32
    %57 = vector.broadcast %c7_i32 : i32 to vector<16x128xi32>
    %58 = arith.cmpi slt, %56, %57 : vector<16x128xi32>
    %cst_42 = arith.constant -1.000000e+30 : f32
    %59 = vector.broadcast %cst_42 : f32 to vector<16x128xf32>
    %60 = arith.select %58, %55, %59 : vector<16x128xi1>, vector<16x128xf32>
    %cst_43 = arith.constant dense<0xFF800000> : vector<16xf32>
    %61 = vector.multi_reduction <maximumf>, %60, %cst_43 [1] : vector<16x128xf32> to vector<16xf32>
    %62 = vector.shape_cast %61 : vector<16xf32> to vector<16x1xf32>
    %63 = vector.broadcast %62 : vector<16x1xf32> to vector<16x128xf32>
    %64 = arith.subf %60, %63 : vector<16x128xf32>
    %65 = math.exp %64 : vector<16x128xf32>
    %cst_44 = arith.constant dense<0.000000e+00> : vector<16xf32>
    %66 = vector.multi_reduction <add>, %65, %cst_44 [1] : vector<16x128xf32> to vector<16xf32>
    %67 = vector.shape_cast %66 : vector<16xf32> to vector<16x1xf32>
    %68 = tpu.reciprocal %67 : vector<16x1xf32> -> vector<16x1xf32>
    %69 = vector.broadcast %68 : vector<16x1xf32> to vector<16x128xf32>
    %70 = arith.mulf %65, %69 : vector<16x128xf32>
    %c0_45 = arith.constant 0 : index
    %c0_46 = arith.constant 0 : index
    %71 = vector.load %arg16[%c0_45, %c0_46] : memref<16x128xf32, #tpu.memory_space<vmem>>, vector<16x128xf32>
    tpu.vector_store %arg16[%c0_45, %c0_46], %70 {strides = array<i32>} : memref<16x128xf32, #tpu.memory_space<vmem>>, vector<16x128xf32>,
    %72 = arith.truncf %55 : vector<16x128xf32> to vector<16x128xbf16>
    %c0_47 = arith.constant 0 : index
    %c0_48 = arith.constant 0 : index
    %73 = vector.load %arg17[%c0_47, %c0_48] : memref<16x128xbf16, #tpu.memory_space<vmem>>, vector<16x128xbf16>
    tpu.vector_store %arg17[%c0_47, %c0_48], %72 {strides = array<i32>} : memref<16x128xbf16, #tpu.memory_space<vmem>>, vector<16x128xbf16>,
    %74 = arith.truncf %49 : vector<16x128xf32> to vector<16x128xbf16>
    %c0_49 = arith.constant 0 : index
    %c0_50 = arith.constant 0 : index
    %75 = vector.load %arg18[%c0_49, %c0_50] : memref<16x128xbf16, #tpu.memory_space<vmem>>, vector<16x128xbf16>
    tpu.vector_store %arg18[%c0_49, %c0_50], %74 {strides = array<i32>} : memref<16x128xbf16, #tpu.memory_space<vmem>>, vector<16x128xbf16>,
    return
  }
  func.func @transform_0(%arg0: i32) -> (i32, i32) {
    %c0_i32 = arith.constant 0 : i32
    %c0_i32_0 = arith.constant 0 : i32
    return %arg0, %c0_i32 : i32, i32
  }
  func.func @transform_1(%arg0: i32) -> (i32, i32) {
    %c0_i32 = arith.constant 0 : i32
    %c0_i32_0 = arith.constant 0 : i32
    return %arg0, %c0_i32 : i32, i32
  }
  func.func @transform_2(%arg0: i32) -> (i32, i32) {
    %c0_i32 = arith.constant 0 : i32
    %c0_i32_0 = arith.constant 0 : i32
    return %arg0, %c0_i32 : i32, i32
  }
  func.func @transform_3(%arg0: i32) -> (i32, i32) {
    %c0_i32 = arith.constant 0 : i32
    %c0_i32_0 = arith.constant 0 : i32
    %c0_i32_1 = arith.constant 0 : i32
    return %c0_i32, %c0_i32_0 : i32, i32
  }
  func.func @transform_4(%arg0: i32) -> (i32, i32) {
    %c0_i32 = arith.constant 0 : i32
    %c0_i32_0 = arith.constant 0 : i32
    %c0_i32_1 = arith.constant 0 : i32
    return %c0_i32, %c0_i32_0 : i32, i32
  }
  func.func @transform_5(%arg0: i32) -> (i32, i32) {
    %c0_i32 = arith.constant 0 : i32
    %c0_i32_0 = arith.constant 0 : i32
    %c0_i32_1 = arith.constant 0 : i32
    return %c0_i32, %c0_i32_0 : i32, i32
  }
  func.func @transform_6(%arg0: i32) -> (i32, i32) {
    %c0_i32 = arith.constant 0 : i32
    %c0_i32_0 = arith.constant 0 : i32
    %c0_i32_1 = arith.constant 0 : i32
    return %c0_i32, %c0_i32_0 : i32, i32
  }
  func.func @transform_7(%arg0: i32) -> (i32, i32) {
    %c0_i32 = arith.constant 0 : i32
    %c0_i32_0 = arith.constant 0 : i32
    %c0_i32_1 = arith.constant 0 : i32
    return %c0_i32, %c0_i32_0 : i32, i32
  }
  func.func @transform_8(%arg0: i32) -> (i32, i32) {
    %c0_i32 = arith.constant 0 : i32
    %c0_i32_0 = arith.constant 0 : i32
    %c0_i32_1 = arith.constant 0 : i32
    return %c0_i32, %c0_i32_0 : i32, i32
  }
  func.func @transform_9(%arg0: i32) -> (i32, i32) {
    %c0_i32 = arith.constant 0 : i32
    %c0_i32_0 = arith.constant 0 : i32
    %c0_i32_1 = arith.constant 0 : i32
    return %c0_i32, %c0_i32_0 : i32, i32
  }
  func.func @transform_10(%arg0: i32) -> (i32, i32) {
    %c0_i32 = arith.constant 0 : i32
    %c0_i32_0 = arith.constant 0 : i32
    %c0_i32_1 = arith.constant 0 : i32
    return %c0_i32, %c0_i32_0 : i32, i32
  }
  func.func @transform_11(%arg0: i32) -> (i32, i32) {
    %c0_i32 = arith.constant 0 : i32
    %c0_i32_0 = arith.constant 0 : i32
    %c0_i32_1 = arith.constant 0 : i32
    return %c0_i32, %c0_i32_0 : i32, i32
  }
  func.func @transform_12(%arg0: i32) -> (i32, i32) {
    %c0_i32 = arith.constant 0 : i32
    %c0_i32_0 = arith.constant 0 : i32
    %c0_i32_1 = arith.constant 0 : i32
    return %c0_i32, %c0_i32_0 : i32, i32
  }
  func.func @transform_13(%arg0: i32) -> (i32, i32) {
    %c0_i32 = arith.constant 0 : i32
    %c0_i32_0 = arith.constant 0 : i32
    %c0_i32_1 = arith.constant 0 : i32
    return %c0_i32, %c0_i32_0 : i32, i32
  }
  func.func @transform_14(%arg0: i32) -> (i32, i32) {
    %c0_i32 = arith.constant 0 : i32
    %c0_i32_0 = arith.constant 0 : i32
    %c0_i32_1 = arith.constant 0 : i32
    return %c0_i32, %c0_i32_0 : i32, i32
  }
  func.func @transform_15(%arg0: i32) -> (i32, i32) {
    %c0_i32 = arith.constant 0 : i32
    %c0_i32_0 = arith.constant 0 : i32
    return %arg0, %c0_i32 : i32, i32
  }
  func.func @transform_16(%arg0: i32) -> (i32, i32) {
    %c0_i32 = arith.constant 0 : i32
    %c0_i32_0 = arith.constant 0 : i32
    return %arg0, %c0_i32 : i32, i32
  }
  func.func @transform_17(%arg0: i32) -> (i32, i32) {
    %c0_i32 = arith.constant 0 : i32
    %c0_i32_0 = arith.constant 0 : i32
    return %arg0, %c0_i32 : i32, i32
  }
}

module attributes {stable_mosaic.version = 11 : i64} {
  func.func @erc_forward_kernel(%arg0: i32, %arg1: memref<16x128xbf16, #tpu.memory_space<vmem>>, %arg2: memref<16x768xbf16, #tpu.memory_space<vmem>>, %arg3: memref<16x128xbf16, #tpu.memory_space<vmem>>, %arg4: memref<128x128xbf16, #tpu.memory_space<vmem>>, %arg5: memref<1x128xf32, #tpu.memory_space<vmem>>, %arg6: memref<768x128xbf16, #tpu.memory_space<vmem>>, %arg7: memref<1x128xf32, #tpu.memory_space<vmem>>, %arg8: memref<128x128xbf16, #tpu.memory_space<vmem>>, %arg9: memref<1x128xf32, #tpu.memory_space<vmem>>, %arg10: memref<384x128xbf16, #tpu.memory_space<vmem>>, %arg11: memref<1x128xf32, #tpu.memory_space<vmem>>, %arg12: memref<128x128xbf16, #tpu.memory_space<vmem>>, %arg13: memref<1x128xf32, #tpu.memory_space<vmem>>, %arg14: memref<128x128xbf16, #tpu.memory_space<vmem>>, %arg15: memref<1x128xf32, #tpu.memory_space<vmem>>, %arg16: memref<16x128xf32, #tpu.memory_space<vmem>>, %arg17: memref<16x128xbf16, #tpu.memory_space<vmem>>, %arg18: memref<16x128xbf16, #tpu.memory_space<vmem>>) attributes {dimension_semantics = [#tpu.dimension_semantics<parallel>], iteration_bounds = array<i64: 1>, scalar_prefetch = 0 : i64, scratch_operands = 0 : i64, tpu.core_type = #tpu.core_type<tc>, window_params = [{transform_indices = @transform_0, window_bounds = array<i64: 16, 128>}, {transform_indices = @transform_1, window_bounds = array<i64: 16, 768>}, {transform_indices = @transform_2, window_bounds = array<i64: 16, 128>}, {pipeline_mode = #tpu.pipeline_mode<synchronous>, transform_indices = @transform_3, window_bounds = array<i64: 128, 128>}, {pipeline_mode = #tpu.pipeline_mode<synchronous>, transform_indices = @transform_4, window_bounds = array<i64: 1, 128>}, {pipeline_mode = #tpu.pipeline_mode<synchronous>, transform_indices = @transform_5, window_bounds = array<i64: 768, 128>}, {pipeline_mode = #tpu.pipeline_mode<synchronous>, transform_indices = @transform_6, window_bounds = array<i64: 1, 128>}, {pipeline_mode = #tpu.pipeline_mode<synchronous>, transform_indices = @transform_7, window_bounds = array<i64: 128, 128>}, {pipeline_mode = #tpu.pipeline_mode<synchronous>, transform_indices = @transform_8, window_bounds = array<i64: 1, 128>}, {pipeline_mode = #tpu.pipeline_mode<synchronous>, transform_indices = @transform_9, window_bounds = array<i64: 384, 128>}, {pipeline_mode = #tpu.pipeline_mode<synchronous>, transform_indices = @transform_10, window_bounds = array<i64: 1, 128>}, {pipeline_mode = #tpu.pipeline_mode<synchronous>, transform_indices = @transform_11, window_bounds = array<i64: 128, 128>}, {pipeline_mode = #tpu.pipeline_mode<synchronous>, transform_indices = @transform_12, window_bounds = array<i64: 1, 128>}, {pipeline_mode = #tpu.pipeline_mode<synchronous>, transform_indices = @transform_13, window_bounds = array<i64: 128, 128>}, {pipeline_mode = #tpu.pipeline_mode<synchronous>, transform_indices = @transform_14, window_bounds = array<i64: 1, 128>}, {transform_indices = @transform_15, window_bounds = array<i64: 16, 128>}, {transform_indices = @transform_16, window_bounds = array<i64: 16, 128>}, {transform_indices = @transform_17, window_bounds = array<i64: 16, 128>}]} {
    %c0 = arith.constant 0 : index
    %c0_0 = arith.constant 0 : index
    %0 = vector.load %arg1[%c0, %c0_0] : memref<16x128xbf16, #tpu.memory_space<vmem>>, vector<16x128xbf16>
    %c0_1 = arith.constant 0 : index
    %c0_2 = arith.constant 0 : index
    %1 = vector.load %arg4[%c0_1, %c0_2] : memref<128x128xbf16, #tpu.memory_space<vmem>>, vector<128x128xbf16>
    %cst = arith.constant dense<0.000000e+00> : vector<16x128xf32>
    %2 = tpu.matmul %0, %1, %cst {dimension_numbers = #tpu.dot_dimension_numbers<[1], [0], [0], [1], [0, 0, 1, 1], [], []>} : vector<16x128xbf16>, vector<128x128xbf16>, vector<16x128xf32> -> vector<16x128xf32>
    %c0_3 = arith.constant 0 : index
    %c0_4 = arith.constant 0 : index
    %3 = vector.load %arg5[%c0_3, %c0_4] : memref<1x128xf32, #tpu.memory_space<vmem>>, vector<1x128xf32>
    %4 = vector.broadcast %3 : vector<1x128xf32> to vector<16x128xf32>
    %5 = arith.addf %2, %4 : vector<16x128xf32>
    %c0_5 = arith.constant 0 : index
    %c0_6 = arith.constant 0 : index
    %6 = vector.load %arg2[%c0_5, %c0_6] : memref<16x768xbf16, #tpu.memory_space<vmem>>, vector<16x768xbf16>
    %c0_7 = arith.constant 0 : index
    %c0_8 = arith.constant 0 : index
    %7 = vector.load %arg6[%c0_7, %c0_8] : memref<768x128xbf16, #tpu.memory_space<vmem>>, vector<768x128xbf16>
    %cst_9 = arith.constant dense<0.000000e+00> : vector<16x128xf32>
    %8 = tpu.matmul %6, %7, %cst_9 {dimension_numbers = #tpu.dot_dimension_numbers<[1], [0], [0], [1], [0, 0, 1, 1], [], []>} : vector<16x768xbf16>, vector<768x128xbf16>, vector<16x128xf32> -> vector<16x128xf32>
    %c0_10 = arith.constant 0 : index
    %c0_11 = arith.constant 0 : index
    %9 = vector.load %arg7[%c0_10, %c0_11] : memref<1x128xf32, #tpu.memory_space<vmem>>, vector<1x128xf32>
    %10 = vector.broadcast %9 : vector<1x128xf32> to vector<16x128xf32>
    %11 = arith.addf %8, %10 : vector<16x128xf32>
    %c0_12 = arith.constant 0 : index
    %c0_13 = arith.constant 0 : index
    %12 = vector.load %arg3[%c0_12, %c0_13] : memref<16x128xbf16, #tpu.memory_space<vmem>>, vector<16x128xbf16>
    %c0_14 = arith.constant 0 : index
    %c0_15 = arith.constant 0 : index
    %13 = vector.load %arg8[%c0_14, %c0_15] : memref<128x128xbf16, #tpu.memory_space<vmem>>, vector<128x128xbf16>
    %cst_16 = arith.constant dense<0.000000e+00> : vector<16x128xf32>
    %14 = tpu.matmul %12, %13, %cst_16 {dimension_numbers = #tpu.dot_dimension_numbers<[1], [0], [0], [1], [0, 0, 1, 1], [], []>} : vector<16x128xbf16>, vector<128x128xbf16>, vector<16x128xf32> -> vector<16x128xf32>
    %c0_17 = arith.constant 0 : index
    %c0_18 = arith.constant 0 : index
    %15 = vector.load %arg9[%c0_17, %c0_18] : memref<1x128xf32, #tpu.memory_space<vmem>>, vector<1x128xf32>
    %16 = vector.broadcast %15 : vector<1x128xf32> to vector<16x128xf32>
    %17 = arith.addf %14, %16 : vector<16x128xf32>
    %18 = arith.truncf %5 : vector<16x128xf32> to vector<16x128xbf16>
    %c0_19 = arith.constant 0 : index
    %c0_20 = arith.constant 0 : index
    %19 = vector.load %arg10[%c0_19, %c0_20] : memref<384x128xbf16, #tpu.memory_space<vmem>>, vector<128x128xbf16>
    %cst_21 = arith.constant dense<0.000000e+00> : vector<16x128xf32>
    %20 = tpu.matmul %18, %19, %cst_21 {dimension_numbers = #tpu.dot_dimension_numbers<[1], [0], [0], [1], [0, 0, 1, 1], [], []>} : vector<16x128xbf16>, vector<128x128xbf16>, vector<16x128xf32> -> vector<16x128xf32>
    %21 = arith.truncf %11 : vector<16x128xf32> to vector<16x128xbf16>
    %c128 = arith.constant 128 : index
    %c0_22 = arith.constant 0 : index
    %22 = vector.load %arg10[%c128, %c0_22] : memref<384x128xbf16, #tpu.memory_space<vmem>>, vector<128x128xbf16>
    %cst_23 = arith.constant dense<0.000000e+00> : vector<16x128xf32>
    %23 = tpu.matmul %21, %22, %cst_23 {dimension_numbers = #tpu.dot_dimension_numbers<[1], [0], [0], [1], [0, 0, 1, 1], [], []>} : vector<16x128xbf16>, vector<128x128xbf16>, vector<16x128xf32> -> vector<16x128xf32>
    %24 = arith.addf %20, %23 : vector<16x128xf32>
    %25 = arith.truncf %17 : vector<16x128xf32> to vector<16x128xbf16>
    %c256 = arith.constant 256 : index
    %c0_24 = arith.constant 0 : index
    %26 = vector.load %arg10[%c256, %c0_24] : memref<384x128xbf16, #tpu.memory_space<vmem>>, vector<128x128xbf16>
    %cst_25 = arith.constant dense<0.000000e+00> : vector<16x128xf32>
    %27 = tpu.matmul %25, %26, %cst_25 {dimension_numbers = #tpu.dot_dimension_numbers<[1], [0], [0], [1], [0, 0, 1, 1], [], []>} : vector<16x128xbf16>, vector<128x128xbf16>, vector<16x128xf32> -> vector<16x128xf32>
    %28 = arith.addf %24, %27 : vector<16x128xf32>
    %c0_26 = arith.constant 0 : index
    %c0_27 = arith.constant 0 : index
    %29 = vector.load %arg11[%c0_26, %c0_27] : memref<1x128xf32, #tpu.memory_space<vmem>>, vector<1x128xf32>
    %30 = vector.broadcast %29 : vector<1x128xf32> to vector<16x128xf32>
    %31 = arith.addf %28, %30 : vector<16x128xf32>
    %cst_28 = arith.constant 0.000000e+00 : f32
    %32 = vector.broadcast %cst_28 : f32 to vector<16x128xf32>
    %33 = arith.maximumf %31, %32 : vector<16x128xf32>
    %34 = arith.truncf %33 : vector<16x128xf32> to vector<16x128xbf16>
    %c0_29 = arith.constant 0 : index
    %c0_30 = arith.constant 0 : index
    %35 = vector.load %arg12[%c0_29, %c0_30] : memref<128x128xbf16, #tpu.memory_space<vmem>>, vector<128x128xbf16>
    %cst_31 = arith.constant dense<0.000000e+00> : vector<16x128xf32>
    %36 = tpu.matmul %34, %35, %cst_31 {dimension_numbers = #tpu.dot_dimension_numbers<[1], [0], [0], [1], [0, 0, 1, 1], [], []>} : vector<16x128xbf16>, vector<128x128xbf16>, vector<16x128xf32> -> vector<16x128xf32>
    %c0_32 = arith.constant 0 : index
    %c0_33 = arith.constant 0 : index
    %37 = vector.load %arg13[%c0_32, %c0_33] : memref<1x128xf32, #tpu.memory_space<vmem>>, vector<1x128xf32>
    %38 = vector.broadcast %37 : vector<1x128xf32> to vector<16x128xf32>
    %39 = arith.addf %36, %38 : vector<16x128xf32>
    %cst_34 = arith.constant 0.000000e+00 : f32
    %40 = vector.broadcast %cst_34 : f32 to vector<16x128xf32>
    %41 = arith.maximumf %39, %40 : vector<16x128xf32>
    %42 = arith.mulf %41, %41 : vector<16x128xf32>
    %cst_35 = arith.constant dense<0.000000e+00> : vector<16xf32>
    %43 = vector.multi_reduction <add>, %42, %cst_35 [1] : vector<16x128xf32> to vector<16xf32>
    %44 = vector.shape_cast %43 : vector<16xf32> to vector<16x1xf32>
    %cst_36 = arith.constant 1.000000e-24 : f32
    %45 = vector.broadcast %cst_36 : f32 to vector<16x1xf32>
    %46 = arith.maximumf %44, %45 : vector<16x1xf32>
    %47 = math.rsqrt %46 : vector<16x1xf32>
    %48 = vector.broadcast %47 : vector<16x1xf32> to vector<16x128xf32>
    %49 = arith.mulf %41, %48 : vector<16x128xf32>
    %50 = arith.truncf %49 : vector<16x128xf32> to vector<16x128xbf16>
    %c0_37 = arith.constant 0 : index
    %c0_38 = arith.constant 0 : index
    %51 = vector.load %arg14[%c0_37, %c0_38] : memref<128x128xbf16, #tpu.memory_space<vmem>>, vector<128x128xbf16>
    %cst_39 = arith.constant dense<0.000000e+00> : vector<16x128xf32>
    %52 = tpu.matmul %50, %51, %cst_39 {dimension_numbers = #tpu.dot_dimension_numbers<[1], [0], [0], [1], [0, 0, 1, 1], [], []>} : vector<16x128xbf16>, vector<128x128xbf16>, vector<16x128xf32> -> vector<16x128xf32>
    %c0_40 = arith.constant 0 : index
    %c0_41 = arith.constant 0 : index
    %53 = vector.load %arg15[%c0_40, %c0_41] : memref<1x128xf32, #tpu.memory_space<vmem>>, vector<1x128xf32>
    %54 = vector.broadcast %53 : vector<1x128xf32> to vector<16x128xf32>
    %55 = arith.addf %52, %54 : vector<16x128xf32>
    %56 = tpu.iota {dimensions = array<i32: 1>} : vector<16x128xi32>
    %c7_i32 = arith.constant 7 : i32
    %57 = vector.broadcast %c7_i32 : i32 to vector<16x128xi32>
    %58 = arith.cmpi slt, %56, %57 : vector<16x128xi32>
    %cst_42 = arith.constant -1.000000e+30 : f32
    %59 = vector.broadcast %cst_42 : f32 to vector<16x128xf32>
    %60 = arith.select %58, %55, %59 : vector<16x128xi1>, vector<16x128xf32>
    %cst_43 = arith.constant dense<0xFF800000> : vector<16xf32>
    %61 = vector.multi_reduction <maximumf>, %60, %cst_43 [1] : vector<16x128xf32> to vector<16xf32>
    %62 = vector.shape_cast %61 : vector<16xf32> to vector<16x1xf32>
    %63 = vector.broadcast %62 : vector<16x1xf32> to vector<16x128xf32>
    %64 = arith.subf %60, %63 : vector<16x128xf32>
    %65 = math.exp %64 : vector<16x128xf32>
    %cst_44 = arith.constant dense<0.000000e+00> : vector<16xf32>
    %66 = vector.multi_reduction <add>, %65, %cst_44 [1] : vector<16x128xf32> to vector<16xf32>
    %67 = vector.shape_cast %66 : vector<16xf32> to vector<16x1xf32>
    %68 = tpu.reciprocal %67 : vector<16x1xf32> -> vector<16x1xf32>
    %69 = vector.broadcast %68 : vector<16x1xf32> to vector<16x128xf32>
    %70 = arith.mulf %65, %69 : vector<16x128xf32>
    %c0_45 = arith.constant 0 : index
    %c0_46 = arith.constant 0 : index
    %71 = vector.load %arg16[%c0_45, %c0_46] : memref<16x128xf32, #tpu.memory_space<vmem>>, vector<16x128xf32>
    tpu.vector_store %arg16[%c0_45, %c0_46], %70 {strides = array<i32>} : memref<16x128xf32, #tpu.memory_space<vmem>>, vector<16x128xf32>,
    %72 = arith.truncf %55 : vector<16x128xf32> to vector<16x128xbf16>
    %c0_47 = arith.constant 0 : index
    %c0_48 = arith.constant 0 : index
    %73 = vector.load %arg17[%c0_47, %c0_48] : memref<16x128xbf16, #tpu.memory_space<vmem>>, vector<16x128xbf16>
    tpu.vector_store %arg17[%c0_47, %c0_48], %72 {strides = array<i32>} : memref<16x128xbf16, #tpu.memory_space<vmem>>, vector<16x128xbf16>,
    %74 = arith.truncf %49 : vector<16x128xf32> to vector<16x128xbf16>
    %c0_49 = arith.constant 0 : index
    %c0_50 = arith.constant 0 : index
    %75 = vector.load %arg18[%c0_49, %c0_50] : memref<16x128xbf16, #tpu.memory_space<vmem>>, vector<16x128xbf16>
    tpu.vector_store %arg18[%c0_49, %c0_50], %74 {strides = array<i32>} : memref<16x128xbf16, #tpu.memory_space<vmem>>, vector<16x128xbf16>,
    return
  }
  func.func @transform_0(%arg0: i32) -> (i32, i32) {
    %c0_i32 = arith.constant 0 : i32
    %c0_i32_0 = arith.constant 0 : i32
    return %arg0, %c0_i32 : i32, i32
  }
  func.func @transform_1(%arg0: i32) -> (i32, i32) {
    %c0_i32 = arith.constant 0 : i32
    %c0_i32_0 = arith.constant 0 : i32
    return %arg0, %c0_i32 : i32, i32
  }
  func.func @transform_2(%arg0: i32) -> (i32, i32) {
    %c0_i32 = arith.constant 0 : i32
    %c0_i32_0 = arith.constant 0 : i32
    return %arg0, %c0_i32 : i32, i32
  }
  func.func @transform_3(%arg0: i32) -> (i32, i32) {
    %c0_i32 = arith.constant 0 : i32
    %c0_i32_0 = arith.constant 0 : i32
    %c0_i32_1 = arith.constant 0 : i32
    return %c0_i32, %c0_i32_0 : i32, i32
  }
  func.func @transform_4(%arg0: i32) -> (i32, i32) {
    %c0_i32 = arith.constant 0 : i32
    %c0_i32_0 = arith.constant 0 : i32
    %c0_i32_1 = arith.constant 0 : i32
    return %c0_i32, %c0_i32_0 : i32, i32
  }
  func.func @transform_5(%arg0: i32) -> (i32, i32) {
    %c0_i32 = arith.constant 0 : i32
    %c0_i32_0 = arith.constant 0 : i32
    %c0_i32_1 = arith.constant 0 : i32
    return %c0_i32, %c0_i32_0 : i32, i32
  }
  func.func @transform_6(%arg0: i32) -> (i32, i32) {
    %c0_i32 = arith.constant 0 : i32
    %c0_i32_0 = arith.constant 0 : i32
    %c0_i32_1 = arith.constant 0 : i32
    return %c0_i32, %c0_i32_0 : i32, i32
  }
  func.func @transform_7(%arg0: i32) -> (i32, i32) {
    %c0_i32 = arith.constant 0 : i32
    %c0_i32_0 = arith.constant 0 : i32
    %c0_i32_1 = arith.constant 0 : i32
    return %c0_i32, %c0_i32_0 : i32, i32
  }
  func.func @transform_8(%arg0: i32) -> (i32, i32) {
    %c0_i32 = arith.constant 0 : i32
    %c0_i32_0 = arith.constant 0 : i32
    %c0_i32_1 = arith.constant 0 : i32
    return %c0_i32, %c0_i32_0 : i32, i32
  }
  func.func @transform_9(%arg0: i32) -> (i32, i32) {
    %c0_i32 = arith.constant 0 : i32
    %c0_i32_0 = arith.constant 0 : i32
    %c0_i32_1 = arith.constant 0 : i32
    return %c0_i32, %c0_i32_0 : i32, i32
  }
  func.func @transform_10(%arg0: i32) -> (i32, i32) {
    %c0_i32 = arith.constant 0 : i32
    %c0_i32_0 = arith.constant 0 : i32
    %c0_i32_1 = arith.constant 0 : i32
    return %c0_i32, %c0_i32_0 : i32, i32
  }
  func.func @transform_11(%arg0: i32) -> (i32, i32) {
    %c0_i32 = arith.constant 0 : i32
    %c0_i32_0 = arith.constant 0 : i32
    %c0_i32_1 = arith.constant 0 : i32
    return %c0_i32, %c0_i32_0 : i32, i32
  }
  func.func @transform_12(%arg0: i32) -> (i32, i32) {
    %c0_i32 = arith.constant 0 : i32
    %c0_i32_0 = arith.constant 0 : i32
    %c0_i32_1 = arith.constant 0 : i32
    return %c0_i32, %c0_i32_0 : i32, i32
  }
  func.func @transform_13(%arg0: i32) -> (i32, i32) {
    %c0_i32 = arith.constant 0 : i32
    %c0_i32_0 = arith.constant 0 : i32
    %c0_i32_1 = arith.constant 0 : i32
    return %c0_i32, %c0_i32_0 : i32, i32
  }
  func.func @transform_14(%arg0: i32) -> (i32, i32) {
    %c0_i32 = arith.constant 0 : i32
    %c0_i32_0 = arith.constant 0 : i32
    %c0_i32_1 = arith.constant 0 : i32
    return %c0_i32, %c0_i32_0 : i32, i32
  }
  func.func @transform_15(%arg0: i32) -> (i32, i32) {
    %c0_i32 = arith.constant 0 : i32
    %c0_i32_0 = arith.constant 0 : i32
    return %arg0, %c0_i32 : i32, i32
  }
  func.func @transform_16(%arg0: i32) -> (i32, i32) {
    %c0_i32 = arith.constant 0 : i32
    %c0_i32_0 = arith.constant 0 : i32
    return %arg0, %c0_i32 : i32, i32
  }
  func.func @transform_17(%arg0: i32) -> (i32, i32) {
    %c0_i32 = arith.constant 0 : i32
    %c0_i32_0 = arith.constant 0 : i32
    return %arg0, %c0_i32 : i32, i32
  }
}

</mosaic_0001>

<bundles_post_ra>
// kernel: tpu_custom_call.1
= control target key start
LH: loop header
LB: loop body
LE: loop exit
PB: predicated region body
PF: predicated region fallthrough
CT: control target
= control target key end

     0   :  { %s2837_s0 = inlined_call_operand.hbm [shape: bf16[16,128], index: 0, kind: input, shape index: {}]   ;;  %s2838_s1 = inlined_call_operand.hbm [shape: bf16[16,768], index: 1, kind: input, shape index: {}]   ;;  %s2839_s2 = inlined_call_operand.hbm [shape: bf16[16,128], index: 2, kind: input, shape index: {}]   ;;  %s2840_s3 = inlined_call_operand.hbm [shape: bf16[128,128], index: 3, kind: input, shape index: {}]   ;;  %s2841_s4 = inlined_call_operand.vmem [shape: f32[1,128], index: 4, kind: input, shape index: {}]   ;;  %s2842_s5 = inlined_call_operand.hbm [shape: bf16[768,128], index: 5, kind: input, shape index: {}]   ;;  %s2843_s6 = inlined_call_operand.vmem [shape: f32[1,128], index: 6, kind: input, shape index: {}]   ;;  %s2844_s7 = inlined_call_operand.hbm [shape: bf16[128,128], index: 7, kind: input, shape index: {}]   ;;  %s2845_s8 = inlined_call_operand.vmem [shape: f32[1,128], index: 8, kind: input, shape index: {}]   ;;  %s2846_s9 = inlined_call_operand.hbm [shape: bf16[384,128], index: 9, kind: input, shape index: {}]   ;;  %s2847_s10 = inlined_call_operand.vmem [shape: f32[1,128], index: 10, kind: input, shape index: {}]   ;;  %s2848_s11 = inlined_call_operand.hbm [shape: bf16[128,128], index: 11, kind: input, shape index: {}]   ;;  %s2849_s12 = inlined_call_operand.vmem [shape: f32[1,128], index: 12, kind: input, shape index: {}]   ;;  %s2850_s13 = inlined_call_operand.hbm [shape: bf16[128,128], index: 13, kind: input, shape index: {}]   ;;  %s2851_s14 = inlined_call_operand.vmem [shape: f32[1,128], index: 14, kind: input, shape index: {}]   ;;  %s2852_s15 = inlined_call_operand.hbm [shape: f32[16,128], index: 15, kind: output, shape index: {0}]   ;;  %s2853_s16 = inlined_call_operand.hbm [shape: bf16[16,128], index: 16, kind: output, shape index: {1}]   ;;  %s2854_s17 = inlined_call_operand.hbm [shape: bf16[16,128], index: 17, kind: output, shape index: {2}]  }
   0x1   :  { %2859 = sst [smem:[#allocation28_spill]] %s2837_s0 }
   0x2   :  { %2860 = sst [smem:[#allocation29_spill]] %s2838_s1 }
   0x3   :  { %2861 = sst [smem:[#allocation30_spill]] %s2852_s15 }
   0x4   :  { %2862 = sst [smem:[#allocation31_spill]] %s2854_s17 }
   0x5   :  { %23 = vsyncpa [#allocation3], 0 }
   0x6   :  { %24 = vsyncpa [#allocation6], 0 }
   0x7   :  { %25 = vsyncpa [#allocation9], 0 }
   0x8   :  { %26 = vsyncpa [#allocation12], 0 }
   0x9   :  { %27 = vsyncpa [#allocation15], 0 }
   0xa   :  { %28 = vsyncpa [#allocation4], 0 }
   0xb   :  { %29 = vsyncpa [#allocation19], 0  ;;  %s2465_s24 = smov [#allocation5]   ;;  %s2863_s28 = sld [smem:[#allocation29_spill]] }
   0xc   :  { %s47_s25 = sshll.u32 %s2465_s24, 4  ;;  %s48_s25 = int_to_ptr.vmem [resolvable:$true] %s47_s25 }
  0x11   :  { %s2187_s29 = scalar_lea.hbm %s2863_s28, 768 }
  0x12   :  { %p2188_p0 = scmp.ne.s32.totalorder %s2863_s28, %s2187_s29  ;;  %p2191_p1 = scmp.lt.u32.totalorder %s2187_s29, %s2863_s28 }
  0x14   :  { %p2193_p2 = pnand %p2191_p1, %p2188_p0 }
  0x16   :  { %2196 = shalt.err (!%p2193_p2)
}
  0x17   :  { %s2197_s1 = scalar_lea.vmem %s48_s25, 768  ;;  %p2202_p4 = scmp.lt.s32.totalorder %s48_s25, %s48_s25 }
  0x18   :  { %p2198_p3 = scmp.ne.s32.totalorder %s48_s25, %s2197_s1  ;;  %p2203_p5 = scmp.lt.s32.totalorder %s2197_s1, %s2197_s1 }
  0x1a   :  { %p2204_p6 = por %p2203_p5, %p2202_p4 }
  0x1c   :  { %p2205_p7 = pnand %p2204_p6, %p2198_p3 }
  0x1e   :  { %2208 = shalt.err (!%p2205_p7)
}
  0x1f   :  { %s2466_s20 = smov 384   ;;  %s2467_s21 = smov 24  }
  0x20   :  { %53 = dma.hbm_to_vmem [thread:$0]  %s2863_s28, 768, %s48_s25, [#allocation6], %s2466_s20, %s2466_s20, %s2467_s21  }
  0x21   :  { %s2468_s24 = smov [#allocation8]   ;;  %s2469_s27 = smov [#allocation11]  }
  0x22   :  { %s71_s26 = sshll.u32 %s2468_s24, 4  ;;  %s99_s29 = sshll.u32 %s2469_s27, 4  ;;  %s72_s26 = int_to_ptr.vmem [resolvable:$true] %s71_s26  ;;  %s100_s29 = int_to_ptr.vmem [resolvable:$true] %s99_s29 }
  0x23   :  { %s2209_s18 = scalar_lea.hbm %s2840_s3, 1024 }
  0x24   :  { %p2210_p8 = scmp.ne.s32.totalorder %s2840_s3, %s2209_s18  ;;  %p2213_p9 = scmp.lt.u32.totalorder %s2209_s18, %s2840_s3 }
  0x26   :  { %p2215_p10 = pnand %p2213_p9, %p2210_p8 }
  0x28   :  { %2218 = shalt.err (!%p2215_p10)
}
  0x29   :  { %s2219_s25 = scalar_lea.vmem %s72_s26, 1024  ;;  %p2224_p12 = scmp.lt.s32.totalorder %s72_s26, %s72_s26 }
  0x2a   :  { %p2220_p11 = scmp.ne.s32.totalorder %s72_s26, %s2219_s25  ;;  %p2225_p13 = scmp.lt.s32.totalorder %s2219_s25, %s2219_s25 }
  0x2c   :  { %p2226_p0 = por %p2225_p13, %p2224_p12 }
  0x2e   :  { %p2227_p1 = pnand %p2226_p0, %p2220_p11 }
  0x30   :  { %2230 = shalt.err (!%p2227_p1)
}
  0x31   :  { %s2470_s28 = smov 64   ;;  %s2471_s20 = smov 4  }
  0x32   :  { %77 = dma.hbm_to_vmem [thread:$0]  %s2840_s3, 1024, %s72_s26, [#allocation9], %s2470_s28, %s2470_s28, %s2471_s20  }
  0x33   :  { %s2231_s23 = scalar_lea.hbm %s2844_s7, 1024 }
  0x34   :  { %p2232_p2 = scmp.ne.s32.totalorder %s2844_s7, %s2231_s23  ;;  %p2235_p3 = scmp.lt.u32.totalorder %s2231_s23, %s2844_s7 }
  0x36   :  { %p2237_p4 = pnand %p2235_p3, %p2232_p2 }
  0x38   :  { %2240 = shalt.err (!%p2237_p4)
}
  0x39   :  { %s2241_s18 = scalar_lea.vmem %s100_s29, 1024  ;;  %p2246_p6 = scmp.lt.s32.totalorder %s100_s29, %s100_s29 }
  0x3a   :  { %p2242_p5 = scmp.ne.s32.totalorder %s100_s29, %s2241_s18  ;;  %p2247_p7 = scmp.lt.s32.totalorder %s2241_s18, %s2241_s18 }
  0x3c   :  { %p2248_p8 = por %p2247_p7, %p2246_p6 }
  0x3e   :  { %p2249_p9 = pnand %p2248_p8, %p2242_p5 }
  0x40   :  { %2252 = shalt.err (!%p2249_p9)
}
  0x41   :  { %105 = dma.hbm_to_vmem [thread:$0]  %s2844_s7, 1024, %s100_s29, [#allocation12], %s2470_s28, %s2470_s28, %s2471_s20  }
  0x42   :  { %s2472_s19 = smov [#allocation14]   ;;  %s2473_s25 = smov [#allocation2]  }
  0x43   :  { %s127_s1 = sshll.u32 %s2472_s19, 4  ;;  %s35_s21 = sshll.u32 %s2473_s25, 4  ;;  %s128_s1 = int_to_ptr.vmem [resolvable:$true] %s127_s1  ;;  %s36_s21 = int_to_ptr.vmem [resolvable:$true] %s35_s21 }
  0x44   :  { %s2253_s17 = scalar_lea.hbm %s2848_s11, 1024 }
  0x45   :  { %p2254_p10 = scmp.ne.s32.totalorder %s2848_s11, %s2253_s17  ;;  %p2257_p11 = scmp.lt.u32.totalorder %s2253_s17, %s2848_s11 }
  0x47   :  { %p2259_p12 = pnand %p2257_p11, %p2254_p10 }
  0x49   :  { %2262 = shalt.err (!%p2259_p12)
}
  0x4a   :  { %s2263_s7 = scalar_lea.vmem %s128_s1, 1024  ;;  %p2268_p0 = scmp.lt.s32.totalorder %s128_s1, %s128_s1 }
  0x4b   :  { %p2264_p13 = scmp.ne.s32.totalorder %s128_s1, %s2263_s7  ;;  %p2269_p1 = scmp.lt.s32.totalorder %s2263_s7, %s2263_s7 }
  0x4d   :  { %p2270_p2 = por %p2269_p1, %p2268_p0 }
  0x4f   :  { %p2271_p3 = pnand %p2270_p2, %p2264_p13 }
  0x51   :  { %2274 = shalt.err (!%p2271_p3)
}
  0x52   :  { %133 = dma.hbm_to_vmem [thread:$0]  %s2848_s11, 1024, %s128_s1, [#allocation15], %s2470_s28, %s2470_s28, %s2471_s20  }
  0x53   :  { %s2864_s26 = sld [smem:[#allocation28_spill]] }
  0x59   :  { %s2275_s19 = scalar_lea.hbm %s2864_s26, 128 }
  0x5a   :  { %p2276_p4 = scmp.ne.s32.totalorder %s2864_s26, %s2275_s19  ;;  %p2279_p5 = scmp.lt.u32.totalorder %s2275_s19, %s2864_s26 }
  0x5c   :  { %p2281_p6 = pnand %p2279_p5, %p2276_p4 }
  0x5e   :  { %2284 = shalt.err (!%p2281_p6)
}
  0x5f   :  { %s2285_s23 = scalar_lea.vmem %s36_s21, 128  ;;  %p2290_p8 = scmp.lt.s32.totalorder %s36_s21, %s36_s21 }
  0x60   :  { %p2286_p7 = scmp.ne.s32.totalorder %s36_s21, %s2285_s23  ;;  %p2291_p9 = scmp.lt.s32.totalorder %s2285_s23, %s2285_s23 }
  0x62   :  { %p2292_p10 = por %p2291_p9, %p2290_p8 }
  0x64   :  { %p2293_p11 = pnand %p2292_p10, %p2286_p7 }
  0x66   :  { %2296 = shalt.err (!%p2293_p11)
}
  0x67   :  { %41 = dma.hbm_to_vmem [thread:$0]  %s2864_s26, 128, %s36_s21, [#allocation3], %s2470_s28, %s2470_s28, %s2471_s20  }
  0x68   :  { %s2474_s24 = smov [#allocation7]   ;;  %s2475_s0 = smov [#allocation10]  }
  0x69   :  { %s59_s27 = sshll.u32 %s2474_s24, 4  ;;  %s85_s7 = sshll.u32 %s2475_s0, 4  ;;  %s60_s27 = int_to_ptr.vmem [resolvable:$true] %s59_s27  ;;  %s86_s7 = int_to_ptr.vmem [resolvable:$true] %s85_s7 }
  0x6a   :  { %s2297_s18 = scalar_lea.hbm %s2839_s2, 128 }
  0x6b   :  { %p2298_p12 = scmp.ne.s32.totalorder %s2839_s2, %s2297_s18  ;;  %p2301_p13 = scmp.lt.u32.totalorder %s2297_s18, %s2839_s2 }
  0x6d   :  { %p2303_p0 = pnand %p2301_p13, %p2298_p12 }
  0x6f   :  { %2306 = shalt.err (!%p2303_p0)
}
  0x70   :  { %s2307_s21 = scalar_lea.vmem %s60_s27, 128  ;;  %p2312_p2 = scmp.lt.s32.totalorder %s60_s27, %s60_s27 }
  0x71   :  { %p2308_p1 = scmp.ne.s32.totalorder %s60_s27, %s2307_s21  ;;  %p2313_p3 = scmp.lt.s32.totalorder %s2307_s21, %s2307_s21 }
  0x73   :  { %p2314_p4 = por %p2313_p3, %p2312_p2 }
  0x75   :  { %p2315_p5 = pnand %p2314_p4, %p2308_p1 }
  0x77   :  { %2318 = shalt.err (!%p2315_p5)
}
  0x78   :  { %65 = dma.hbm_to_vmem [thread:$0]  %s2839_s2, 128, %s60_s27, [#allocation6], %s2470_s28, %s2470_s28, %s2471_s20  }
  0x79   :  { %s2319_s11 = scalar_lea.hbm %s2842_s5, 6144 }
  0x7a   :  { %p2320_p6 = scmp.ne.s32.totalorder %s2842_s5, %s2319_s11  ;;  %p2323_p7 = scmp.lt.u32.totalorder %s2319_s11, %s2842_s5 }
  0x7c   :  { %p2325_p8 = pnand %p2323_p7, %p2320_p6 }
  0x7e   :  { %2328 = shalt.err (!%p2325_p8)
}
  0x7f   :  { %s2329_s30 = scalar_lea.vmem %s86_s7, 6144  ;;  %p2334_p10 = scmp.lt.s32.totalorder %s86_s7, %s86_s7 }
  0x80   :  { %p2330_p9 = scmp.ne.s32.totalorder %s86_s7, %s2329_s30  ;;  %p2335_p11 = scmp.lt.s32.totalorder %s2329_s30, %s2329_s30 }
  0x82   :  { %p2336_p12 = por %p2335_p11, %p2334_p10 }
  0x84   :  { %p2337_p13 = pnand %p2336_p12, %p2330_p9 }
  0x86   :  { %2340 = shalt.err (!%p2337_p13)
}
  0x87   :  { %91 = dma.hbm_to_vmem [thread:$0]  %s2842_s5, 6144, %s86_s7, [#allocation9], %s2470_s28, %s2470_s28, %s2471_s20  }
  0x88   :  { %s2476_s18 = smov [#allocation13]   ;;  %s2477_s19 = smov [#allocation16]  }
  0x89   :  { %s113_s3 = sshll.u32 %s2476_s18, 4  ;;  %s141_s25 = sshll.u32 %s2477_s19, 4  ;;  %s114_s3 = int_to_ptr.vmem [resolvable:$true] %s113_s3  ;;  %s142_s25 = int_to_ptr.vmem [resolvable:$true] %s141_s25 }
  0x8a   :  { %s2341_s26 = scalar_lea.hbm %s2846_s9, 3072 }
  0x8b   :  { %p2342_p0 = scmp.ne.s32.totalorder %s2846_s9, %s2341_s26  ;;  %p2345_p1 = scmp.lt.u32.totalorder %s2341_s26, %s2846_s9 }
  0x8d   :  { %p2347_p2 = pnand %p2345_p1, %p2342_p0 }
  0x8f   :  { %2350 = shalt.err (!%p2347_p2)
}
  0x90   :  { %s2351_s5 = scalar_lea.vmem %s114_s3, 3072  ;;  %p2356_p4 = scmp.lt.s32.totalorder %s114_s3, %s114_s3 }
  0x91   :  { %p2352_p3 = scmp.ne.s32.totalorder %s114_s3, %s2351_s5  ;;  %p2357_p5 = scmp.lt.s32.totalorder %s2351_s5, %s2351_s5 }
  0x93   :  { %p2358_p6 = por %p2357_p5, %p2356_p4 }
  0x95   :  { %p2359_p7 = pnand %p2358_p6, %p2352_p3 }
  0x97   :  { %2362 = shalt.err (!%p2359_p7)
}
  0x98   :  { %119 = dma.hbm_to_vmem [thread:$0]  %s2846_s9, 3072, %s114_s3, [#allocation12], %s2470_s28, %s2470_s28, %s2471_s20  }
  0x99   :  { %s2363_s29 = scalar_lea.hbm %s2850_s13, 1024 }
  0x9a   :  { %p2364_p8 = scmp.ne.s32.totalorder %s2850_s13, %s2363_s29  ;;  %p2367_p9 = scmp.lt.u32.totalorder %s2363_s29, %s2850_s13 }
  0x9c   :  { %p2369_p10 = pnand %p2367_p9, %p2364_p8 }
  0x9e   :  { %2372 = shalt.err (!%p2369_p10)
}
  0x9f   :  { %s2373_s19 = scalar_lea.vmem %s142_s25, 1024  ;;  %p2378_p12 = scmp.lt.s32.totalorder %s142_s25, %s142_s25 }
  0xa0   :  { %p2374_p11 = scmp.ne.s32.totalorder %s142_s25, %s2373_s19  ;;  %p2379_p13 = scmp.lt.s32.totalorder %s2373_s19, %s2373_s19 }
  0xa2   :  { %p2380_p0 = por %p2379_p13, %p2378_p12 }
  0xa4   :  { %p2381_p1 = pnand %p2380_p0, %p2374_p11 }
  0xa6   :  { %2384 = shalt.err (!%p2381_p1)
}
  0xa7   :  { %147 = dma.hbm_to_vmem [thread:$0]  %s2850_s13, 1024, %s142_s25, [#allocation15], %s2470_s28, %s2470_s28, %s2471_s20  }
  0xa8   :  { %2451 = dma.done.wait [#allocation3], 128  }
  0xa9   :  { %2452 = vsyncadd [#allocation3], 4294967168 }
  0xaa   :  { %2453 = dma.done.wait [#allocation6], 896  }
  0xab   :  { %2454 = vsyncadd [#allocation6], 4294966400 }
  0xac   :  { %2455 = dma.done.wait [#allocation9], 7168  }
  0xad   :  { %2456 = vsyncadd [#allocation9], 4294960128 }
  0xae   :  { %2457 = dma.done.wait [#allocation12], 4096  }
  0xaf   :  { %2458 = vsyncadd [#allocation12], 4294963200 }
  0xb0   :  { %2459 = dma.done.wait [#allocation15], 2048  }
  0xb1   :  { %2460 = vsyncadd [#allocation15], 4294965248  ;;  %v2478_v0 = vmov 0.0   ;;  %vm2479_vm0 = vmmov 0   ;;  %v2060_v1 = vld [vmem:[#allocation8] sm:$0xff]   ;;  %v2063_v4 = vld [vmem:[#allocation8 + $0x8] sm:$0xff]  }
  0xb2   :  { %1900 = vmatprep.subr.bf16.mxu0 %v2478_v0  ;;  %1916 = vmatprep.mubr.msk.bf16.mxu0 %vm2479_vm0, %v2478_v0  ;;  %v2061_v2 = vld [vmem:[#allocation10 + $0x40] sm:$0xff]   ;;  %v2064_v5 = vld [vmem:[#allocation10 + $0x48] sm:$0xff]   ;;  %v2066_v7 = vld [vmem:[#allocation8 + $0x10] sm:$0xff]  }
  0xb3   :  { %1901 = vmatpush3.bf16.msra.mxu0 %v2060_v1  ;;  %v2062_v3 = vld [vmem:[#allocation10] sm:$0xff]   ;;  %1780 = vmatprep.subr.bf16.mxu1 %v2061_v2  ;;  %v2065_v6 = vld [vmem:[#allocation10 + $0x8] sm:$0xff]   ;;  %v2067_v8 = vld [vmem:[#allocation10 + $0x50] sm:$0xff]  }
  0xb4   :  { %1902 = vmatprep.subr.bf16.mxu0 %v2478_v0  ;;  %1781 = vmatpush3.bf16.msra.mxu1 %v2062_v3  ;;  %v2068_v9 = vld [vmem:[#allocation10 + $0x10] sm:$0xff]   ;;  %v2069_v10 = vld [vmem:[#allocation8 + $0x18] sm:$0xff]   ;;  %v2073_v13 = vld [vmem:[#allocation10 + $0x60] sm:$0xff]  }
  0xb5   :  { %1782 = vmatprep.subr.bf16.mxu1 %v2064_v5  ;;  %v2070_v11 = vld [vmem:[#allocation10 + $0x58] sm:$0xff]   ;;  %v2072_v14 = vld [vmem:[#allocation8 + $0x20] sm:$0xff]   ;;  %v2076_v16 = vld [vmem:[#allocation10 + $0x68] sm:$0xff]  }
  0xb6   :  { %v2071_v12 = vld [vmem:[#allocation10 + $0x18] sm:$0xff]   ;;  %v2074_v15 = vld [vmem:[#allocation10 + $0x20] sm:$0xff]   ;;  %v2075_v17 = vld [vmem:[#allocation8 + $0x28] sm:$0xff]  }
  0xb7   :  { %1903 = vmatpush3.bf16.msra.mxu0 %v2063_v4  ;;  %v2077_v18 = vld [vmem:[#allocation10 + $0x28] sm:$0xff]   ;;  %v2079_v19 = vld [vmem:[#allocation10 + $0x70] sm:$0xff]   ;;  %v2081_v22 = vld [vmem:[#allocation8 + $0x38] sm:$0xff]  }
  0xb8   :  { %1904 = vmatprep.subr.bf16.mxu0 %v2478_v0  ;;  %1783 = vmatpush3.bf16.msra.mxu1 %v2065_v6  ;;  %v2078_v20 = vld [vmem:[#allocation8 + $0x30] sm:$0xff]   ;;  %v2082_v23 = vld [vmem:[#allocation10 + $0x78] sm:$0xff]   ;;  %v2087_v25 = vld [vmem:[#allocation5 + $0x4] ss:$24 sps:$4 sm:$0xff]  }
  0xb9   :  { %1784 = vmatprep.subr.bf16.mxu1 %v2067_v8  ;;  %v2080_v21 = vld [vmem:[#allocation10 + $0x30] sm:$0xff]   ;;  %v2083_v24 = vld [vmem:[#allocation10 + $0x38] sm:$0xff]   ;;  %v2088_v26 = vld [vmem:[#allocation10 + $0xc0] sm:$0xff]   ;;  %757 = vmatprep.mubr.bf16.mxu1 %v2087_v25 }
  0xba   :  { %v2084_v27 = vld [vmem:[#allocation2] sm:$0xff]   ;;  %v2092_v31 = vld [vmem:[#allocation10 + $0xc8] sm:$0xff]   ;;  %v2096_v35 = vld [vmem:[#allocation10 + $0xd0] sm:$0xff]  }
  0xbb   :  { %1905 = vmatpush3.bf16.msra.mxu0 %v2066_v7  ;;  %v2085_v28 = vld [vmem:[#allocation5] ss:$24 sps:$4 sm:$0xff]   ;;  %v2098_v37 = vld [vmem:[#allocation10 + $0x150] sm:$0xff]   ;;  %v2100_v39 = vld [vmem:[#allocation10 + $0xd8] sm:$0xff]  }
  0xbc   :  { %1906 = vmatprep.subr.bf16.mxu0 %v2478_v0  ;;  %1785 = vmatpush3.bf16.msra.mxu1 %v2068_v9  ;;  %v2090_v29 = vld [vmem:[#allocation10 + $0x140] sm:$0xff]   ;;  %v2094_v33 = vld [vmem:[#allocation10 + $0x148] sm:$0xff]   ;;  %v2097_v38 = vld [vmem:[#allocation10 + $0x90] sm:$0xff]  }
  0xbd   :  { %1786 = vmatprep.subr.bf16.mxu1 %v2070_v11  ;;  %v2089_v30 = vld [vmem:[#allocation10 + $0x80] sm:$0xff]   ;;  %v2093_v34 = vld [vmem:[#allocation10 + $0x88] sm:$0xff]   ;;  %v2099_v40 = vld [vmem:[#allocation10 + $0x110] sm:$0xff]  }
  0xbe   :  { %v2091_v32 = vld [vmem:[#allocation10 + $0x100] sm:$0xff]   ;;  %v2095_v36 = vld [vmem:[#allocation10 + $0x108] sm:$0xff]   ;;  %v2102_v41 = vld [vmem:[#allocation10 + $0x158] sm:$0xff]  }
  0xbf   :  { %1907 = vmatpush3.bf16.msra.mxu0 %v2069_v10  ;;  %v2101_v42 = vld [vmem:[#allocation10 + $0x98] sm:$0xff]   ;;  %v2104_v43 = vld [vmem:[#allocation10 + $0xe0] sm:$0xff]   ;;  %v2108_v47 = vld [vmem:[#allocation10 + $0xe8] sm:$0xff]  }
  0xc0   :  { %1908 = vmatprep.subr.bf16.mxu0 %v2478_v0  ;;  %1787 = vmatpush3.bf16.msra.mxu1 %v2071_v12  ;;  %v2103_v44 = vld [vmem:[#allocation10 + $0x118] sm:$0xff]   ;;  %v2106_v45 = vld [vmem:[#allocation10 + $0x160] sm:$0xff]   ;;  %v2110_v49 = vld [vmem:[#allocation10 + $0x168] sm:$0xff]  }
  0xc1   :  { %1788 = vmatprep.subr.bf16.mxu1 %v2073_v13  ;;  %v2105_v46 = vld [vmem:[#allocation10 + $0xa0] sm:$0xff]   ;;  %v2109_v50 = vld [vmem:[#allocation10 + $0xa8] sm:$0xff]   ;;  %v2112_v51 = vld [vmem:[#allocation10 + $0xf0] sm:$0xff]  }
  0xc2   :  { %v2107_v48 = vld [vmem:[#allocation10 + $0x120] sm:$0xff]   ;;  %v2111_v52 = vld [vmem:[#allocation10 + $0x128] sm:$0xff]   ;;  %v2114_v53 = vld [vmem:[#allocation10 + $0x170] sm:$0xff]  }
  0xc3   :  { %1909 = vmatpush3.bf16.msra.mxu0 %v2072_v14  ;;  %v2113_v54 = vld [vmem:[#allocation10 + $0xb0] sm:$0xff]   ;;  %v2116_v55 = vld [vmem:[#allocation10 + $0xf8] sm:$0xff]   ;;  %v2126_v63 = vld [vmem:[#allocation11] sm:$0xff]  }
  0xc4   :  { %1910 = vmatprep.subr.bf16.mxu0 %v2478_v0  ;;  %1789 = vmatpush3.bf16.msra.mxu1 %v2074_v15  ;;  %v2115_v56 = vld [vmem:[#allocation10 + $0x130] sm:$0xff]   ;;  %v2118_v57 = vld [vmem:[#allocation10 + $0x178] sm:$0xff]   ;;  %v2127_v2 = vld [vmem:[#allocation11 + $0x8] sm:$0xff]  }
  0xc5   :  { %1790 = vmatprep.subr.bf16.mxu1 %v2076_v16  ;;  %v2117_v58 = vld [vmem:[#allocation10 + $0xb8] sm:$0xff]   ;;  %v2122_v59 = vld [vmem:[#allocation5 + $0xc] ss:$24 sps:$4 sm:$0xff]   ;;  %v2120_v62 = vld [vmem:[#allocation5 + $0x8] ss:$24 sps:$4 sm:$0xff]  }
  0xc6   :  { %v2119_v60 = vld [vmem:[#allocation10 + $0x138] sm:$0xff]   ;;  %v2128_v3 = vld [vmem:[#allocation11 + $0x10] sm:$0xff]   ;;  %v2130_v5 = vld [vmem:[#allocation11 + $0x20] sm:$0xff]  }
  0xc7   :  { %1911 = vmatpush3.bf16.msra.mxu0 %v2075_v17  ;;  %v2125_v61 = vld [vmem:[#allocation5 + $0x14] ss:$24 sps:$4 sm:$0xff]   ;;  %v2123_v1 = vld [vmem:[#allocation5 + $0x10] ss:$24 sps:$4 sm:$0xff]   ;;  %v2131_v6 = vld [vmem:[#allocation11 + $0x28] sm:$0xff]  }
  0xc8   :  { %1912 = vmatprep.subr.bf16.mxu0 %v2478_v0  ;;  %1791 = vmatpush3.bf16.msra.mxu1 %v2077_v18  ;;  %v2129_v4 = vld [vmem:[#allocation11 + $0x18] sm:$0xff]   ;;  %v2132_v7 = vld [vmem:[#allocation11 + $0x30] sm:$0xff]   ;;  %v2135_v10 = vld [vmem:[#allocation13] sm:$0xff]  }
  0xc9   :  { %1792 = vmatprep.subr.bf16.mxu1 %v2079_v19  ;;  %v2133_v8 = vld [vmem:[#allocation11 + $0x38] sm:$0xff]   ;;  %v2136_v11 = vld [vmem:[#allocation13 + $0x8] sm:$0xff]   ;;  %v2137_v12 = vld [vmem:[#allocation13 + $0x10] sm:$0xff]  }
  0xca   :  { %v2134_v9 = vld [vmem:[#allocation7] sm:$0xff]   ;;  %v2139_v14 = vld [vmem:[#allocation13 + $0x20] sm:$0xff]   ;;  %v2140_v15 = vld [vmem:[#allocation13 + $0x28] sm:$0xff]  }
  0xcb   :  { %1913 = vmatpush3.bf16.msra.mxu0 %v2078_v20  ;;  %v2138_v13 = vld [vmem:[#allocation13 + $0x18] sm:$0xff]   ;;  %v2141_v16 = vld [vmem:[#allocation13 + $0x30] sm:$0xff]   ;;  %v2143_v18 = vld [vmem:[#allocation13 + $0x40] sm:$0xff]  }
  0xcc   :  { %1914 = vmatprep.subr.bf16.mxu0 %v2478_v0  ;;  %1793 = vmatpush3.bf16.msra.mxu1 %v2080_v21  ;;  %v2142_v17 = vld [vmem:[#allocation13 + $0x38] sm:$0xff]   ;;  %v2144_v19 = vld [vmem:[#allocation13 + $0x48] sm:$0xff]   ;;  %v2145_v20 = vld [vmem:[#allocation13 + $0x50] sm:$0xff]  }
  0xcd   :  { %1794 = vmatprep.subr.bf16.mxu1 %v2082_v23  ;;  %v2146_v21 = vld [vmem:[#allocation13 + $0x58] sm:$0xff]   ;;  %v2148_v23 = vld [vmem:[#allocation13 + $0x68] sm:$0xff]  }
  0xce   :  { %v2150_v25 = vld [vmem:[#allocation13 + $0x78] sm:$0xff]  }
  0xcf   :  { %1915 = vmatpush3.bf16.msra.mxu0 %v2081_v22  ;;  %v2147_v22 = vld [vmem:[#allocation13 + $0x60] sm:$0xff]  }
  0xd0   :  { %1802 = vmatprep.subr.bf16.mxu0 %v2088_v26  ;;  %1795 = vmatpush3.bf16.msra.mxu1 %v2083_v24  ;;  %v2149_v24 = vld [vmem:[#allocation13 + $0x70] sm:$0xff]   ;;  %v1635_v26 = vld [vmem:[%s2841_s4] ss:$0 sm:$0xff] }
  0xd1   :  { %1824 = vmatprep.subr.bf16.mxu1 %v2090_v29 }
  0xd2   :  { %1917 = vmatmul.mubr.bf16.vlgmr.msra.gmra.mrb[0].mxu0 %v2084_v27 }
  0xd3   :  { %1803 = vmatpush3.bf16.msra.mxu0 %v2089_v30  ;;  %758 = vmatmul.mubr.bf16.vlgmr.msra.gmra.mrb[0].mxu1 %v2085_v28 }
  0xd4   :  { %1804 = vmatprep.subr.bf16.mxu0 %v2092_v31  ;;  %1825 = vmatpush3.bf16.msra.mxu1 %v2091_v32 }
  0xd5   :  { %1826 = vmatprep.subr.bf16.mxu1 %v2094_v33  ;;  %798 = vmatprep.mubr.bf16.mxu0 %v2122_v59  ;;  %v2151_v59 = vld [vmem:[#allocation13 + $0x80] sm:$0xff]  }
  0xd6   :  { %839 = vmatprep.mubr.bf16.mxu1 %v2125_v61  ;;  %v2152_v61 = vld [vmem:[#allocation13 + $0x88] sm:$0xff]  }
  0xd7   :  { %1805 = vmatpush3.bf16.msra.mxu0 %v2093_v34 }
  0xd8   :  { %1806 = vmatprep.subr.bf16.mxu0 %v2096_v35  ;;  %1827 = vmatpush3.bf16.msra.mxu1 %v2095_v36 }
  0xd9   :  { %1828 = vmatprep.subr.bf16.mxu1 %v2098_v37 }
  0xdb   :  { %1807 = vmatpush3.bf16.msra.mxu0 %v2097_v38 }
  0xdc   :  { %1808 = vmatprep.subr.bf16.mxu0 %v2100_v39  ;;  %1829 = vmatpush3.bf16.msra.mxu1 %v2099_v40  ;;  %v1645_v40 = vld [vmem:[%s2843_s6] ss:$0 sm:$0xff] }
  0xdd   :  { %1830 = vmatprep.subr.bf16.mxu1 %v2102_v41 }
  0xdf   :  { %1809 = vmatpush3.bf16.msra.mxu0 %v2101_v42 }
  0xe0   :  { %1810 = vmatprep.subr.bf16.mxu0 %v2104_v43  ;;  %1831 = vmatpush3.bf16.msra.mxu1 %v2103_v44 }
  0xe1   :  { %1832 = vmatprep.subr.bf16.mxu1 %v2106_v45 }
  0xe3   :  { %1811 = vmatpush3.bf16.msra.mxu0 %v2105_v46 }
  0xe4   :  { %1812 = vmatprep.subr.bf16.mxu0 %v2108_v47  ;;  %1833 = vmatpush3.bf16.msra.mxu1 %v2107_v48 }
  0xe5   :  { %1834 = vmatprep.subr.bf16.mxu1 %v2110_v49 }
  0xe7   :  { %1813 = vmatpush3.bf16.msra.mxu0 %v2109_v50 }
  0xe8   :  { %1814 = vmatprep.subr.bf16.mxu0 %v2112_v51  ;;  %1835 = vmatpush3.bf16.msra.mxu1 %v2111_v52 }
  0xe9   :  { %1836 = vmatprep.subr.bf16.mxu1 %v2114_v53 }
  0xeb   :  { %1815 = vmatpush3.bf16.msra.mxu0 %v2113_v54 }
  0xec   :  { %1816 = vmatprep.subr.bf16.mxu0 %v2116_v55  ;;  %1837 = vmatpush3.bf16.msra.mxu1 %v2115_v56 }
  0xed   :  { %1838 = vmatprep.subr.bf16.mxu1 %v2118_v57 }
  0xef   :  { %1817 = vmatpush3.bf16.msra.mxu0 %v2117_v58 }
  0xf0   :  { %1920 = vmatprep.subr.bf16.mxu0 %v2478_v0  ;;  %1839 = vmatpush3.bf16.msra.mxu1 %v2119_v60 }
  0xf1   :  { %1940 = vmatprep.subr.bf16.mxu1 %v2478_v0 }
  0xf2   :  { %799 = vmatmul.mubr.bf16.vlgmr.msra.gmra.mrb[4].mxu0 %v2120_v62  ;;  %v2153_v62 = vld [vmem:[#allocation13 + $0x90] sm:$0xff]  }
  0xf3   :  { %1921 = vmatpush3.bf16.msra.mxu0 %v2126_v63  ;;  %1936 = vmatprep.mubr.msk.bf16.mxu0 %vm2479_vm0, %v2478_v0  ;;  %v2154_v63 = vld [vmem:[#allocation13 + $0x98] sm:$0xff]  }
  0xf4   :  { %840 = vmatmul.mubr.bf16.vlgmr.msra.gmra.mrb[4].mxu1 %v2123_v1  ;;  %1922 = vmatprep.subr.bf16.mxu0 %v2478_v0  ;;  %v2155_v1 = vld [vmem:[#allocation13 + $0xa0] sm:$0xff]  }
  0xf5   :  { %1956 = vmatprep.mubr.msk.bf16.mxu1 %vm2479_vm0, %v2478_v0  ;;  %1941 = vmatpush3.bf16.msra.mxu1 %v2143_v18  ;;  %v2164_v18 = vld [vmem:[#allocation14 + $0x28] sm:$0xff]  }
  0xf6   :  { %1942 = vmatprep.subr.bf16.mxu1 %v2478_v0 }
  0xf7   :  { %1923 = vmatpush3.bf16.msra.mxu0 %v2127_v2  ;;  %v2156_v2 = vld [vmem:[#allocation13 + $0xa8] sm:$0xff]  }
  0xf8   :  { %1924 = vmatprep.subr.bf16.mxu0 %v2478_v0 }
  0xf9   :  { %1943 = vmatpush3.bf16.msra.mxu1 %v2144_v19  ;;  %v2165_v19 = vld [vmem:[#allocation14 + $0x30] sm:$0xff]  }
  0xfa   :  { %1944 = vmatprep.subr.bf16.mxu1 %v2478_v0 }
  0xfb   :  { %1925 = vmatpush3.bf16.msra.mxu0 %v2128_v3  ;;  %v1700_v3 = vld [vmem:[%s2845_s8] ss:$0 sm:$0xff] }
  0xfc   :  { %1926 = vmatprep.subr.bf16.mxu0 %v2478_v0 }
  0xfd   :  { %1945 = vmatpush3.bf16.msra.mxu1 %v2145_v20  ;;  %v2166_v20 = vld [vmem:[#allocation14 + $0x38] sm:$0xff]  }
  0xfe   :  { %1946 = vmatprep.subr.bf16.mxu1 %v2478_v0 }
  0xff   :  { %1927 = vmatpush3.bf16.msra.mxu0 %v2129_v4 }
 0x100   :  { %1928 = vmatprep.subr.bf16.mxu0 %v2478_v0 }
 0x101   :  { %1947 = vmatpush3.bf16.msra.mxu1 %v2146_v21 }
 0x102   :  { %1948 = vmatprep.subr.bf16.mxu1 %v2478_v0 }
 0x103   :  { %1929 = vmatpush3.bf16.msra.mxu0 %v2130_v5 }
 0x104   :  { %1930 = vmatprep.subr.bf16.mxu0 %v2478_v0 }
 0x105   :  { %1949 = vmatpush3.bf16.msra.mxu1 %v2147_v22 }
 0x106   :  { %1950 = vmatprep.subr.bf16.mxu1 %v2478_v0 }
 0x107   :  { %1931 = vmatpush3.bf16.msra.mxu0 %v2131_v6 }
 0x108   :  { %1932 = vmatprep.subr.bf16.mxu0 %v2478_v0 }
 0x109   :  { %1951 = vmatpush3.bf16.msra.mxu1 %v2148_v23 }
 0x10a   :  { %1952 = vmatprep.subr.bf16.mxu1 %v2478_v0 }
 0x10b   :  { %1933 = vmatpush3.bf16.msra.mxu0 %v2132_v7  ;;  %v2157_v7 = vld [vmem:[#allocation13 + $0xb0] sm:$0xff]  }
 0x10c   :  { %1934 = vmatprep.subr.bf16.mxu0 %v2478_v0 }
 0x10d   :  { %1953 = vmatpush3.bf16.msra.mxu1 %v2149_v24 }
 0x10e   :  { %1954 = vmatprep.subr.bf16.mxu1 %v2478_v0 }
 0x10f   :  { %1935 = vmatpush3.bf16.msra.mxu0 %v2133_v8 }
 0x110   :  { %1960 = vmatprep.subr.bf16.mxu0 %v2478_v0 }
 0x111   :  { %1955 = vmatpush3.bf16.msra.mxu1 %v2150_v25 }
 0x112   :  { %1937 = vmatmul.mubr.bf16.vlgmr.msra.gmra.mrb[8].mxu0 %v2134_v9  ;;  %1980 = vmatprep.subr.bf16.mxu1 %v2478_v0 }
 0x113   :  { %1961 = vmatpush3.bf16.msra.mxu0 %v2135_v10  ;;  %1976 = vmatprep.mubr.msk.bf16.mxu0 %vm2479_vm0, %v2478_v0 }
 0x114   :  { %1962 = vmatprep.subr.bf16.mxu0 %v2478_v0 }
 0x117   :  { %1963 = vmatpush3.bf16.msra.mxu0 %v2136_v11 }
 0x118   :  { %1964 = vmatprep.subr.bf16.mxu0 %v2478_v0 }
 0x11b   :  { %1965 = vmatpush3.bf16.msra.mxu0 %v2137_v12  ;;  %v2158_v12 = vld [vmem:[#allocation13 + $0xb8] sm:$0xff]  }
 0x11c   :  { %1966 = vmatprep.subr.bf16.mxu0 %v2478_v0 }
 0x11f   :  { %1967 = vmatpush3.bf16.msra.mxu0 %v2138_v13  ;;  %v2159_v13 = vld [vmem:[#allocation14] sm:$0xff]  }
 0x120   :  { %1968 = vmatprep.subr.bf16.mxu0 %v2478_v0 }
 0x123   :  { %1969 = vmatpush3.bf16.msra.mxu0 %v2139_v14  ;;  %v2160_v14 = vld [vmem:[#allocation14 + $0x8] sm:$0xff]  }
 0x124   :  { %1970 = vmatprep.subr.bf16.mxu0 %v2478_v0 }
 0x127   :  { %1971 = vmatpush3.bf16.msra.mxu0 %v2140_v15  ;;  %v2161_v15 = vld [vmem:[#allocation14 + $0x10] sm:$0xff]  }
 0x128   :  { %1972 = vmatprep.subr.bf16.mxu0 %v2478_v0 }
 0x12b   :  { %1973 = vmatpush3.bf16.msra.mxu0 %v2141_v16  ;;  %v2162_v16 = vld [vmem:[#allocation14 + $0x18] sm:$0xff]  }
 0x12c   :  { %1974 = vmatprep.subr.bf16.mxu0 %v2478_v0 }
 0x12f   :  { %1975 = vmatpush3.bf16.msra.mxu0 %v2142_v17  ;;  %v2163_v17 = vld [vmem:[#allocation14 + $0x20] sm:$0xff]  }
 0x130   :  { %2000 = vmatprep.subr.bf16.mxu0 %v2478_v0 }
 0x1a5   :  { %v291_v27 = vpop.f32.mrb[0].mxu0 }
 0x1a6   :  { %v292_v28 = vadd.f32 %v1635_v26, %v291_v27  ;;  %v1918_v29 = vpop.f32.mrb[1].mxu0  ;;  %v1796_v30 = vpop.f32.mrb[0].mxu1 }
 0x1a7   :  { %v294_v31 = vpop.f32.mrb[2].mxu0  ;;  %v1797_v33 = vpop.f32.mrb[1].mxu1 }
 0x1a8   :  { %v295_v32 = vadd.f32 %v1635_v26, %v294_v31  ;;  %v1919_v34 = vpop.f32.mrb[3].mxu0  ;;  %v1798_v35 = vadd.f32 %v1797_v33, %v1796_v30  ;;  %v1799_v36 = vpop.f32.mrb[2].mxu1 }
 0x1a9   :  { %v1800_v38 = vpop.f32.mrb[3].mxu1 }
 0x1aa   :  { %v968_v37 = vpack.c.bf16 %v295_v32, %v292_v28  ;;  %v1801_v39 = vadd.f32 %v1800_v38, %v1799_v36  ;;  %v760_v43 = vadd.f32 %v1798_v35, %v1645_v40  ;;  %v1734_v32 = vld [vmem:[%s2847_s10] ss:$0 sm:$0xff] }
 0x1ac   :  { %1977 = vmatmul.mubr.bf16.vlgmr.msra.gmra.mrb[12].mxu0 %v968_v37  ;;  %v763_v49 = vadd.f32 %v1801_v39, %v1645_v40 }
 0x1ad   :  { %2016 = vmatprep.mubr.msk.bf16.mxu0 %vm2479_vm0, %v2478_v0  ;;  %2001 = vmatpush3.bf16.msra.mxu0 %v2159_v13 }
 0x1ae   :  { %2002 = vmatprep.subr.bf16.mxu0 %v2478_v0 }
 0x1b1   :  { %2003 = vmatpush3.bf16.msra.mxu0 %v2160_v14 }
 0x1b2   :  { %2004 = vmatprep.subr.bf16.mxu0 %v2478_v0 }
 0x1b5   :  { %2005 = vmatpush3.bf16.msra.mxu0 %v2161_v15 }
 0x1b6   :  { %2006 = vmatprep.subr.bf16.mxu0 %v2478_v0 }
 0x1b9   :  { %2007 = vmatpush3.bf16.msra.mxu0 %v2162_v16 }
 0x1ba   :  { %2008 = vmatprep.subr.bf16.mxu0 %v2478_v0 }
 0x1bd   :  { %2009 = vmatpush3.bf16.msra.mxu0 %v2163_v17 }
 0x1be   :  { %2010 = vmatprep.subr.bf16.mxu0 %v2478_v0 }
 0x1c1   :  { %2011 = vmatpush3.bf16.msra.mxu0 %v2164_v18 }
 0x1c2   :  { %2012 = vmatprep.subr.bf16.mxu0 %v2478_v0 }
 0x1c5   :  { %v1818_v41 = vpop.f32.mrb[4].mxu0  ;;  %2013 = vmatpush3.bf16.msra.mxu0 %v2165_v19 }
 0x1c6   :  { %v1819_v42 = vpop.f32.mrb[5].mxu0  ;;  %2014 = vmatprep.subr.bf16.mxu0 %v2478_v0 }
 0x1c7   :  { %v1820_v44 = vadd.f32 %v1819_v42, %v1818_v41  ;;  %v1840_v45 = vpop.f32.mrb[4].mxu1  ;;  %v1821_v46 = vpop.f32.mrb[6].mxu0 }
 0x1c8   :  { %v1841_v47 = vpop.f32.mrb[5].mxu1  ;;  %v1822_v48 = vpop.f32.mrb[7].mxu0 }
 0x1c9   :  { %v801_v50 = vadd.f32 %v1820_v44, %v760_v43  ;;  %v1842_v51 = vadd.f32 %v1841_v47, %v1840_v45  ;;  %v1823_v52 = vadd.f32 %v1822_v48, %v1821_v46  ;;  %v1843_v53 = vpop.f32.mrb[6].mxu1  ;;  %2015 = vmatpush3.bf16.msra.mxu0 %v2166_v20  ;;  %v2167_v43 = vld [vmem:[#allocation16] sm:$0xff]   ;;  %v2168_v44 = vld [vmem:[#allocation16 + $0x8] sm:$0xff]   ;;  %v2169_v45 = vld [vmem:[#allocation16 + $0x10] sm:$0xff]  }
 0x1ca   :  { %v1844_v54 = vpop.f32.mrb[7].mxu1  ;;  %v1735_v46 = vld [vmem:[%s2849_s12] ss:$0 sm:$0xff] }
 0x1cb   :  { %v842_v55 = vadd.f32 %v1842_v51, %v801_v50  ;;  %v804_v56 = vadd.f32 %v1823_v52, %v763_v49  ;;  %v1845_v57 = vadd.f32 %v1844_v54, %v1843_v53 }
 0x1cd   :  { %v845_v58 = vadd.f32 %v1845_v57, %v804_v56  ;;  %v2170_v57 = vld [vmem:[#allocation16 + $0x18] sm:$0xff]  }
 0x1cf   :  { %v985_v60 = vpack.c.bf16 %v845_v58, %v842_v55  ;;  %v2171_v58 = vld [vmem:[#allocation16 + $0x20] sm:$0xff]  }
 0x1d1   :  { %1957 = vmatmul.mubr.bf16.vlgmr.msra.gmra.mrb[8].mxu1 %v985_v60  ;;  %v2173_v60 = vld [vmem:[#allocation16 + $0x30] sm:$0xff]  }
 0x1d2   :  { %1981 = vmatpush3.bf16.msra.mxu1 %v2151_v59  ;;  %1996 = vmatprep.mubr.msk.bf16.mxu1 %vm2479_vm0, %v2478_v0  ;;  %v2172_v59 = vld [vmem:[#allocation16 + $0x28] sm:$0xff]  }
 0x1d3   :  { %1982 = vmatprep.subr.bf16.mxu1 %v2478_v0 }
 0x1d6   :  { %1983 = vmatpush3.bf16.msra.mxu1 %v2152_v61  ;;  %v2174_v61 = vld [vmem:[#allocation16 + $0x38] sm:$0xff]  }
 0x1d7   :  { %1984 = vmatprep.subr.bf16.mxu1 %v2478_v0 }
 0x1da   :  { %1985 = vmatpush3.bf16.msra.mxu1 %v2153_v62 }
 0x1db   :  { %1986 = vmatprep.subr.bf16.mxu1 %v2478_v0 }
 0x1de   :  { %1987 = vmatpush3.bf16.msra.mxu1 %v2154_v63 }
 0x1df   :  { %1988 = vmatprep.subr.bf16.mxu1 %v2478_v0 }
 0x1e2   :  { %1989 = vmatpush3.bf16.msra.mxu1 %v2155_v1 }
 0x1e3   :  { %1990 = vmatprep.subr.bf16.mxu1 %v2478_v0 }
 0x1e5   :  { %v961_v4 = vpop.f32.mrb[8].mxu0 }
 0x1e6   :  { %1991 = vmatpush3.bf16.msra.mxu1 %v2156_v2  ;;  %v962_v5 = vadd.f32 %v1700_v3, %v961_v4  ;;  %v1938_v6 = vpop.f32.mrb[9].mxu0 }
 0x1e7   :  { %v964_v8 = vpop.f32.mrb[10].mxu0  ;;  %1992 = vmatprep.subr.bf16.mxu1 %v2478_v0 }
 0x1e8   :  { %v965_v9 = vadd.f32 %v1700_v3, %v964_v8  ;;  %v1939_v10 = vpop.f32.mrb[11].mxu0  ;;  %v1539_v8 = vlaneseq }
 0x1ea   :  { %v1180_v11 = vpack.c.bf16 %v965_v9, %v962_v5  ;;  %1993 = vmatpush3.bf16.msra.mxu1 %v2157_v7  ;;  %v1540_v9 = vand.u32 127, %v1539_v8 }
 0x1eb   :  { %1994 = vmatprep.subr.bf16.mxu1 %v2478_v0 }
 0x1ec   :  { %vm1541_vm1 = vcmp.lt.s32.totalorder %v1540_v9, 7 }
 0x1ee   :  { %1995 = vmatpush3.bf16.msra.mxu1 %v2158_v12 }
 0x1ef   :  { %2020 = vmatprep.subr.bf16.mxu1 %v2478_v0 }
 0x1f1   :  { %1997 = vmatmul.mubr.bf16.vlgmr.msra.gmra.mrb[12].mxu1 %v1180_v11 }
 0x1f2   :  { %2036 = vmatprep.mubr.msk.bf16.mxu1 %vm2479_vm0, %v2478_v0  ;;  %2021 = vmatpush3.bf16.msra.mxu1 %v2167_v43 }
 0x1f3   :  { %2022 = vmatprep.subr.bf16.mxu1 %v2478_v0 }
 0x1f6   :  { %2023 = vmatpush3.bf16.msra.mxu1 %v2168_v44 }
 0x1f7   :  { %2024 = vmatprep.subr.bf16.mxu1 %v2478_v0 }
 0x1fa   :  { %2025 = vmatpush3.bf16.msra.mxu1 %v2169_v45 }
 0x1fb   :  { %2026 = vmatprep.subr.bf16.mxu1 %v2478_v0 }
 0x1fe   :  { %2027 = vmatpush3.bf16.msra.mxu1 %v2170_v57 }
 0x1ff   :  { %2028 = vmatprep.subr.bf16.mxu1 %v2478_v0 }
 0x202   :  { %2029 = vmatpush3.bf16.msra.mxu1 %v2171_v58 }
 0x203   :  { %2030 = vmatprep.subr.bf16.mxu1 %v2478_v0 }
 0x206   :  { %2031 = vmatpush3.bf16.msra.mxu1 %v2172_v59 }
 0x207   :  { %2032 = vmatprep.subr.bf16.mxu1 %v2478_v0 }
 0x20a   :  { %2033 = vmatpush3.bf16.msra.mxu1 %v2173_v60 }
 0x20b   :  { %2034 = vmatprep.subr.bf16.mxu1 %v2478_v0  ;;  %v1744_v0 = vld [vmem:[%s2851_s14] ss:$0 sm:$0xff]  ;;  %s2480_s14 = smov [#allocation18]  }
 0x20c   :  { %s1600_s23 = sshll.u32 %s2480_s14, 4  ;;  %s1601_s23 = int_to_ptr.vmem [resolvable:$true] %s1600_s23 }
 0x20d   :  { %s2385_s11 = scalar_lea.vmem %s1601_s23, 128  ;;  %p2390_p3 = scmp.lt.s32.totalorder %s1601_s23, %s1601_s23 }
 0x20e   :  { %2035 = vmatpush3.bf16.msra.mxu1 %v2174_v61  ;;  %p2386_p2 = scmp.ne.s32.totalorder %s1601_s23, %s2385_s11  ;;  %p2391_p4 = scmp.lt.s32.totalorder %s2385_s11, %s2385_s11 }
 0x210   :  { %p2392_p5 = por %p2391_p4, %p2390_p3 }
 0x212   :  { %p2393_p6 = pnand %p2392_p5, %p2386_p2 }
 0x27f   :  { %v1173_v21 = vpop.f32.mrb[12].mxu0 }
 0x280   :  { %v1978_v22 = vpop.f32.mrb[13].mxu0 }
 0x281   :  { %v1176_v23 = vpop.f32.mrb[14].mxu0 }
 0x282   :  { %v1979_v24 = vpop.f32.mrb[15].mxu0 }
 0x2a4   :  { %v1084_v25 = vpop.f32.mrb[8].mxu1 }
 0x2a5   :  { %v1174_v26 = vadd.f32 %v1173_v21, %v1084_v25  ;;  %v1958_v27 = vpop.f32.mrb[9].mxu1 }
 0x2a6   :  { %v1087_v28 = vpop.f32.mrb[10].mxu1 }
 0x2a7   :  { %v1177_v29 = vadd.f32 %v1176_v23, %v1087_v28  ;;  %v1959_v30 = vpop.f32.mrb[11].mxu1 }
 0x2c4   :  { %v1279_v31 = vpop.f32.mrb[12].mxu1 }
 0x2c5   :  { %v1286_v33 = vadd.f32 %v1279_v31, %v1174_v26  ;;  %v1998_v34 = vpop.f32.mrb[13].mxu1 }
 0x2c6   :  { %v1282_v35 = vpop.f32.mrb[14].mxu1 }
 0x2c7   :  { %v1295_v36 = vadd.f32 %v1734_v32, %v1286_v33  ;;  %v1287_v37 = vadd.f32 %v1282_v35, %v1177_v29  ;;  %v1999_v38 = vpop.f32.mrb[15].mxu1 }
 0x2c9   :  { %v1296_v39 = vadd.f32 %v1734_v32, %v1287_v37  ;;  %v1297_v40 = vmax.f32 %v1295_v36, 0.0 }
 0x2cb   :  { %v1298_v41 = vmax.f32 %v1296_v39, 0.0 }
 0x2cd   :  { %v1299_v42 = vpack.c.bf16 %v1298_v41, %v1297_v40 }
 0x2cf   :  { %2017 = vmatmul.mubr.bf16.vlgmr.msra.gmra.mrb[16].mxu0 %v1299_v42 }
 0x3a2   :  { %v1405_v47 = vpop.f32.mrb[16].mxu0 }
 0x3a3   :  { %v1406_v48 = vadd.f32 %v1735_v46, %v1405_v47  ;;  %v2018_v49 = vpop.f32.mrb[17].mxu0 }
 0x3a4   :  { %v1408_v50 = vpop.f32.mrb[18].mxu0 }
 0x3a5   :  { %v1412_v51 = vmax.f32 %v1406_v48, 0.0  ;;  %v1409_v52 = vadd.f32 %v1735_v46, %v1408_v50  ;;  %v2019_v53 = vpop.f32.mrb[19].mxu0 }
 0x3a7   :  { %v1413_v54 = vmax.f32 %v1409_v52, 0.0  ;;  %v1414_v55 = vmul.f32 %v1412_v51, %v1412_v51 }
 0x3a9   :  { %1416 = vadd.xlane.f32.xlu0 %v1414_v55  ;;  %v1415_v56 = vmul.f32 %v1413_v54, %v1413_v54 }
 0x3ad   :  { %1418 = vadd.xlane.f32.xlu0 %v1415_v56 }
 0x436   :  { %v1417_v62 = vpop.xlane.xlu0 %1416 }
 0x437   :  { %v1420_v63 = vmax.f32 %v1417_v62, 1e-24 }
 0x439   :  { %2175 = vrsqrt.f32 %v1420_v63 }
 0x43a   :  { %v1419_v1 = vpop.xlane.xlu0 %1418 }
 0x43b   :  { %v1421_v2 = vmax.f32 %v1419_v1, 1e-24 }
 0x43d   :  { %2177 = vrsqrt.f32 %v1421_v2 }
 0x443   :  { %v2176_v3 = vpop.eup %2175 }
 0x444   :  { %v1424_v5 = vmul.f32 %v2176_v3, %v1412_v51 }
 0x447   :  { %v2178_v4 = vpop.eup %2177 }
 0x448   :  { %v1425_v6 = vmul.f32 %v2178_v4, %v1413_v54 }
 0x44a   :  { %v1426_v7 = vpack.c.bf16 %v1425_v6, %v1424_v5 }
 0x44c   :  { %2037 = vmatmul.mubr.bf16.vlgmr.msra.gmra.mrb[16].mxu1 %v1426_v7  ;;  %1770 = vst [vmem:[#allocation20] sm:$0xff] %v1426_v7  }
 0x51f   :  { %v1532_v10 = vpop.f32.mrb[16].mxu1 }
 0x520   :  { %v1533_v11 = vadd.f32 %v1744_v0, %v1532_v10  ;;  %v2038_v12 = vpop.f32.mrb[17].mxu1 }
 0x521   :  { %v1535_v13 = vpop.f32.mrb[18].mxu1 }
 0x522   :  { %v1536_v14 = vadd.f32 %v1744_v0, %v1535_v13  ;;  %v2039_v15 = vpop.f32.mrb[19].mxu1  ;;  %v1542_v16 = vsel %vm1541_vm1, %v1533_v11, -1e+30 }
 0x523   :  { %1544 = vmax.xlane.f32.xlu1 %v1542_v16 }
 0x524   :  { %v1764_v17 = vpack.c.bf16 %v1536_v14, %v1533_v11  ;;  %v1543_v18 = vsel %vm1541_vm1, %v1536_v14, -1e+30 }
 0x526   :  { %1765 = vst [vmem:[#allocation18] sm:$0xff] %v1764_v17  }
 0x527   :  { %1546 = vmax.xlane.f32.xlu1 %v1543_v18 }
 0x5b0   :  { %v1545_v19 = vpop.xlane.xlu1 %1544 }
 0x5b1   :  { %v1548_v20 = vsub.f32 %v1542_v16, %v1545_v19 }
 0x5b3   :  { %v1550_v21 = vmul.f32 1.442695, %v1548_v20 }
 0x5b4   :  { %v1547_v22 = vpop.xlane.xlu1 %1546 }
 0x5b5   :  { %2179 = vpow2.f32 %v1550_v21  ;;  %v1549_v23 = vsub.f32 %v1543_v18, %v1547_v22 }
 0x5b7   :  { %v1552_v24 = vmul.f32 1.442695, %v1549_v23 }
 0x5b9   :  { %2181 = vpow2.f32 %v1552_v24 }
 0x5bf   :  { %v2180_v25 = vpop.eup %2179 }
 0x5c0   :  { %1554 = vadd.xlane.f32.xlu0 %v2180_v25 }
 0x5c3   :  { %v2182_v26 = vpop.eup %2181 }
 0x5c4   :  { %1556 = vadd.xlane.f32.xlu1 %v2182_v26 }
 0x5c5   :  { %2396 = shalt.err (!%p2393_p6)
}
 0x5c6   :  { %s2397_s1 = scalar_lea.hbm %s2853_s16, 128 }
 0x5c7   :  { %p2398_p7 = scmp.ne.s32.totalorder %s2853_s16, %s2397_s1  ;;  %p2401_p8 = scmp.lt.u32.totalorder %s2397_s1, %s2853_s16 }
 0x5c9   :  { %p2403_p9 = pnand %p2401_p8, %p2398_p7 }
 0x5cb   :  { %2406 = shalt.err (!%p2403_p9)
}
 0x5cc   :  { %1606 = dma.vmem_to_hbm [thread:$0]  %s1601_s23, 128, %s2853_s16, [#allocation19], %s2470_s28, %s2470_s28, %s2471_s20  }
 0x5cd   :  { %s2481_s18 = smov [#allocation20]  }
 0x5ce   :  { %s1612_s19 = sshll.u32 %s2481_s18, 4  ;;  %s1613_s19 = int_to_ptr.vmem [resolvable:$true] %s1612_s19 }
 0x5cf   :  { %s2407_s9 = scalar_lea.vmem %s1613_s19, 128  ;;  %p2412_p11 = scmp.lt.s32.totalorder %s1613_s19, %s1613_s19 }
 0x5d0   :  { %p2408_p10 = scmp.ne.s32.totalorder %s1613_s19, %s2407_s9  ;;  %p2413_p12 = scmp.lt.s32.totalorder %s2407_s9, %s2407_s9 }
 0x5d2   :  { %p2414_p13 = por %p2413_p12, %p2412_p11 }
 0x5d4   :  { %p2415_p0 = pnand %p2414_p13, %p2408_p10 }
 0x5d6   :  { %2418 = shalt.err (!%p2415_p0)
}
 0x5d7   :  { %s2865_s25 = sld [smem:[#allocation31_spill]] }
 0x5dd   :  { %s2419_s22 = scalar_lea.hbm %s2865_s25, 128 }
 0x5de   :  { %p2420_p1 = scmp.ne.s32.totalorder %s2865_s25, %s2419_s22  ;;  %p2423_p2 = scmp.lt.u32.totalorder %s2419_s22, %s2865_s25 }
 0x5e0   :  { %p2425_p3 = pnand %p2423_p2, %p2420_p1 }
 0x5e2   :  { %2428 = shalt.err (!%p2425_p3)
}
 0x5e3   :  { %1618 = dma.vmem_to_hbm [thread:$0]  %s1613_s19, 128, %s2865_s25, [#allocation19], %s2470_s28, %s2470_s28, %s2471_s20  }
 0x5e4   :  { %s2482_s10 = smov [#allocation17]  }
 0x5e5   :  { %s1588_s15 = sshll.u32 %s2482_s10, 4  ;;  %s1589_s15 = int_to_ptr.vmem [resolvable:$true] %s1588_s15 }
 0x5e6   :  { %s2429_s12 = scalar_lea.vmem %s1589_s15, 256  ;;  %p2434_p5 = scmp.lt.s32.totalorder %s1589_s15, %s1589_s15 }
 0x5e7   :  { %p2430_p4 = scmp.ne.s32.totalorder %s1589_s15, %s2429_s12  ;;  %p2435_p6 = scmp.lt.s32.totalorder %s2429_s12, %s2429_s12 }
 0x5e9   :  { %p2436_p7 = por %p2435_p6, %p2434_p5 }
 0x5eb   :  { %p2437_p8 = pnand %p2436_p7, %p2430_p4 }
 0x64d   :  { %v1555_v27 = vpop.xlane.xlu0 %1554 }
 0x64e   :  { %2183 = vrcp.f32 %v1555_v27 }
 0x651   :  { %v1557_v28 = vpop.xlane.xlu1 %1556 }
 0x652   :  { %2185 = vrcp.f32 %v1557_v28 }
 0x658   :  { %v2184_v29 = vpop.eup %2183 }
 0x659   :  { %v1560_v30 = vmul.f32 %v2184_v29, %v2180_v25 }
 0x65b   :  { %1562 = vst [vmem:[#allocation17] sm:$0xff] %v1560_v30 }
 0x65c   :  { %v2186_v31 = vpop.eup %2185 }
 0x65d   :  { %v1561_v32 = vmul.f32 %v2186_v31, %v2182_v26 }
 0x65f   :  { %1563 = vst [vmem:[#allocation17 + $0x8] sm:$0xff] %v1561_v32 }
 0x660   :  { %2440 = shalt.err (!%p2437_p8)
}
 0x661   :  { %s2866_s17 = sld [smem:[#allocation30_spill]] }
 0x667   :  { %s2441_s14 = scalar_lea.hbm %s2866_s17, 256 }
 0x668   :  { %p2442_p9 = scmp.ne.s32.totalorder %s2866_s17, %s2441_s14  ;;  %p2445_p10 = scmp.lt.u32.totalorder %s2441_s14, %s2866_s17 }
 0x66a   :  { %p2447_p11 = pnand %p2445_p10, %p2442_p9 }
 0x66c   :  { %2450 = shalt.err (!%p2447_p11)
}
 0x66d   :  { %s2483_s1 = smov 128   ;;  %s2484_s24 = smov 8  }
 0x66e   :  { %1594 = dma.vmem_to_hbm [thread:$0]  %s1589_s15, 256, %s2866_s17, [#allocation4], %s2483_s1, %s2483_s1, %s2484_s24  }
 0x66f   :  { %2461 = dma.done.wait [#allocation4], 256  }
 0x670   :  { %2462 = vsyncadd [#allocation4], 4294967040 }
 0x671   :  { %2463 = dma.done.wait [#allocation19], 256  }
 0x672   :  { %2464 = vsyncadd [#allocation19], 4294967040 }
 0x673   :  { %1628 = vsyncpa [#allocation3], 1 }
 0x674   :  { %1629 = vsyncpa [#allocation6], 1 }
 0x675   :  { %1630 = vsyncpa [#allocation9], 1 }
 0x676   :  { %1631 = vsyncpa [#allocation12], 1 }
 0x677   :  { %1632 = vsyncpa [#allocation15], 1 }
 0x678   :  { %1633 = vsyncpa [#allocation4], 1 }
 0x679   :  { %1634 = vsyncpa [#allocation19], 1 }

// kernel: tpu_custom_call.1
= control target key start
LH: loop header
LB: loop body
LE: loop exit
PB: predicated region body
PF: predicated region fallthrough
CT: control target
= control target key end

     0   :  { %s2837_s0 = inlined_call_operand.hbm [shape: bf16[16,128], index: 0, kind: input, shape index: {}]   ;;  %s2838_s1 = inlined_call_operand.hbm [shape: bf16[16,768], index: 1, kind: input, shape index: {}]   ;;  %s2839_s2 = inlined_call_operand.hbm [shape: bf16[16,128], index: 2, kind: input, shape index: {}]   ;;  %s2840_s3 = inlined_call_operand.hbm [shape: bf16[128,128], index: 3, kind: input, shape index: {}]   ;;  %s2841_s4 = inlined_call_operand.vmem [shape: f32[1,128], index: 4, kind: input, shape index: {}]   ;;  %s2842_s5 = inlined_call_operand.hbm [shape: bf16[768,128], index: 5, kind: input, shape index: {}]   ;;  %s2843_s6 = inlined_call_operand.vmem [shape: f32[1,128], index: 6, kind: input, shape index: {}]   ;;  %s2844_s7 = inlined_call_operand.hbm [shape: bf16[128,128], index: 7, kind: input, shape index: {}]   ;;  %s2845_s8 = inlined_call_operand.vmem [shape: f32[1,128], index: 8, kind: input, shape index: {}]   ;;  %s2846_s9 = inlined_call_operand.hbm [shape: bf16[384,128], index: 9, kind: input, shape index: {}]   ;;  %s2847_s10 = inlined_call_operand.vmem [shape: f32[1,128], index: 10, kind: input, shape index: {}]   ;;  %s2848_s11 = inlined_call_operand.hbm [shape: bf16[128,128], index: 11, kind: input, shape index: {}]   ;;  %s2849_s12 = inlined_call_operand.vmem [shape: f32[1,128], index: 12, kind: input, shape index: {}]   ;;  %s2850_s13 = inlined_call_operand.hbm [shape: bf16[128,128], index: 13, kind: input, shape index: {}]   ;;  %s2851_s14 = inlined_call_operand.vmem [shape: f32[1,128], index: 14, kind: input, shape index: {}]   ;;  %s2852_s15 = inlined_call_operand.hbm [shape: f32[16,128], index: 15, kind: output, shape index: {0}]   ;;  %s2853_s16 = inlined_call_operand.hbm [shape: bf16[16,128], index: 16, kind: output, shape index: {1}]   ;;  %s2854_s17 = inlined_call_operand.hbm [shape: bf16[16,128], index: 17, kind: output, shape index: {2}]  }
   0x1   :  { %2859 = sst [smem:[#allocation28_spill]] %s2837_s0 }
   0x2   :  { %2860 = sst [smem:[#allocation29_spill]] %s2838_s1 }
   0x3   :  { %2861 = sst [smem:[#allocation30_spill]] %s2852_s15 }
   0x4   :  { %2862 = sst [smem:[#allocation31_spill]] %s2854_s17 }
   0x5   :  { %23 = vsyncpa [#allocation3], 0 }
   0x6   :  { %24 = vsyncpa [#allocation6], 0 }
   0x7   :  { %25 = vsyncpa [#allocation9], 0 }
   0x8   :  { %26 = vsyncpa [#allocation12], 0 }
   0x9   :  { %27 = vsyncpa [#allocation15], 0 }
   0xa   :  { %28 = vsyncpa [#allocation4], 0 }
   0xb   :  { %29 = vsyncpa [#allocation19], 0  ;;  %s2465_s24 = smov [#allocation5]   ;;  %s2863_s28 = sld [smem:[#allocation29_spill]] }
   0xc   :  { %s47_s25 = sshll.u32 %s2465_s24, 4  ;;  %s48_s25 = int_to_ptr.vmem [resolvable:$true] %s47_s25 }
  0x11   :  { %s2187_s29 = scalar_lea.hbm %s2863_s28, 768 }
  0x12   :  { %p2188_p0 = scmp.ne.s32.totalorder %s2863_s28, %s2187_s29  ;;  %p2191_p1 = scmp.lt.u32.totalorder %s2187_s29, %s2863_s28 }
  0x14   :  { %p2193_p2 = pnand %p2191_p1, %p2188_p0 }
  0x16   :  { %2196 = shalt.err (!%p2193_p2)
}
  0x17   :  { %s2197_s1 = scalar_lea.vmem %s48_s25, 768  ;;  %p2202_p4 = scmp.lt.s32.totalorder %s48_s25, %s48_s25 }
  0x18   :  { %p2198_p3 = scmp.ne.s32.totalorder %s48_s25, %s2197_s1  ;;  %p2203_p5 = scmp.lt.s32.totalorder %s2197_s1, %s2197_s1 }
  0x1a   :  { %p2204_p6 = por %p2203_p5, %p2202_p4 }
  0x1c   :  { %p2205_p7 = pnand %p2204_p6, %p2198_p3 }
  0x1e   :  { %2208 = shalt.err (!%p2205_p7)
}
  0x1f   :  { %s2466_s20 = smov 384   ;;  %s2467_s21 = smov 24  }
  0x20   :  { %53 = dma.hbm_to_vmem [thread:$0]  %s2863_s28, 768, %s48_s25, [#allocation6], %s2466_s20, %s2466_s20, %s2467_s21  }
  0x21   :  { %s2468_s24 = smov [#allocation8]   ;;  %s2469_s27 = smov [#allocation11]  }
  0x22   :  { %s71_s26 = sshll.u32 %s2468_s24, 4  ;;  %s99_s29 = sshll.u32 %s2469_s27, 4  ;;  %s72_s26 = int_to_ptr.vmem [resolvable:$true] %s71_s26  ;;  %s100_s29 = int_to_ptr.vmem [resolvable:$true] %s99_s29 }
  0x23   :  { %s2209_s18 = scalar_lea.hbm %s2840_s3, 1024 }
  0x24   :  { %p2210_p8 = scmp.ne.s32.totalorder %s2840_s3, %s2209_s18  ;;  %p2213_p9 = scmp.lt.u32.totalorder %s2209_s18, %s2840_s3 }
  0x26   :  { %p2215_p10 = pnand %p2213_p9, %p2210_p8 }
  0x28   :  { %2218 = shalt.err (!%p2215_p10)
}
  0x29   :  { %s2219_s25 = scalar_lea.vmem %s72_s26, 1024  ;;  %p2224_p12 = scmp.lt.s32.totalorder %s72_s26, %s72_s26 }
  0x2a   :  { %p2220_p11 = scmp.ne.s32.totalorder %s72_s26, %s2219_s25  ;;  %p2225_p13 = scmp.lt.s32.totalorder %s2219_s25, %s2219_s25 }
  0x2c   :  { %p2226_p0 = por %p2225_p13, %p2224_p12 }
  0x2e   :  { %p2227_p1 = pnand %p2226_p0, %p2220_p11 }
  0x30   :  { %2230 = shalt.err (!%p2227_p1)
}
  0x31   :  { %s2470_s28 = smov 64   ;;  %s2471_s20 = smov 4  }
  0x32   :  { %77 = dma.hbm_to_vmem [thread:$0]  %s2840_s3, 1024, %s72_s26, [#allocation9], %s2470_s28, %s2470_s28, %s2471_s20  }
  0x33   :  { %s2231_s23 = scalar_lea.hbm %s2844_s7, 1024 }
  0x34   :  { %p2232_p2 = scmp.ne.s32.totalorder %s2844_s7, %s2231_s23  ;;  %p2235_p3 = scmp.lt.u32.totalorder %s2231_s23, %s2844_s7 }
  0x36   :  { %p2237_p4 = pnand %p2235_p3, %p2232_p2 }
  0x38   :  { %2240 = shalt.err (!%p2237_p4)
}
  0x39   :  { %s2241_s18 = scalar_lea.vmem %s100_s29, 1024  ;;  %p2246_p6 = scmp.lt.s32.totalorder %s100_s29, %s100_s29 }
  0x3a   :  { %p2242_p5 = scmp.ne.s32.totalorder %s100_s29, %s2241_s18  ;;  %p2247_p7 = scmp.lt.s32.totalorder %s2241_s18, %s2241_s18 }
  0x3c   :  { %p2248_p8 = por %p2247_p7, %p2246_p6 }
  0x3e   :  { %p2249_p9 = pnand %p2248_p8, %p2242_p5 }
  0x40   :  { %2252 = shalt.err (!%p2249_p9)
}
  0x41   :  { %105 = dma.hbm_to_vmem [thread:$0]  %s2844_s7, 1024, %s100_s29, [#allocation12], %s2470_s28, %s2470_s28, %s2471_s20  }
  0x42   :  { %s2472_s19 = smov [#allocation14]   ;;  %s2473_s25 = smov [#allocation2]  }
  0x43   :  { %s127_s1 = sshll.u32 %s2472_s19, 4  ;;  %s35_s21 = sshll.u32 %s2473_s25, 4  ;;  %s128_s1 = int_to_ptr.vmem [resolvable:$true] %s127_s1  ;;  %s36_s21 = int_to_ptr.vmem [resolvable:$true] %s35_s21 }
  0x44   :  { %s2253_s17 = scalar_lea.hbm %s2848_s11, 1024 }
  0x45   :  { %p2254_p10 = scmp.ne.s32.totalorder %s2848_s11, %s2253_s17  ;;  %p2257_p11 = scmp.lt.u32.totalorder %s2253_s17, %s2848_s11 }
  0x47   :  { %p2259_p12 = pnand %p2257_p11, %p2254_p10 }
  0x49   :  { %2262 = shalt.err (!%p2259_p12)
}
  0x4a   :  { %s2263_s7 = scalar_lea.vmem %s128_s1, 1024  ;;  %p2268_p0 = scmp.lt.s32.totalorder %s128_s1, %s128_s1 }
  0x4b   :  { %p2264_p13 = scmp.ne.s32.totalorder %s128_s1, %s2263_s7  ;;  %p2269_p1 = scmp.lt.s32.totalorder %s2263_s7, %s2263_s7 }
  0x4d   :  { %p2270_p2 = por %p2269_p1, %p2268_p0 }
  0x4f   :  { %p2271_p3 = pnand %p2270_p2, %p2264_p13 }
  0x51   :  { %2274 = shalt.err (!%p2271_p3)
}
  0x52   :  { %133 = dma.hbm_to_vmem [thread:$0]  %s2848_s11, 1024, %s128_s1, [#allocation15], %s2470_s28, %s2470_s28, %s2471_s20  }
  0x53   :  { %s2864_s26 = sld [smem:[#allocation28_spill]] }
  0x59   :  { %s2275_s19 = scalar_lea.hbm %s2864_s26, 128 }
  0x5a   :  { %p2276_p4 = scmp.ne.s32.totalorder %s2864_s26, %s2275_s19  ;;  %p2279_p5 = scmp.lt.u32.totalorder %s2275_s19, %s2864_s26 }
  0x5c   :  { %p2281_p6 = pnand %p2279_p5, %p2276_p4 }
  0x5e   :  { %2284 = shalt.err (!%p2281_p6)
}
  0x5f   :  { %s2285_s23 = scalar_lea.vmem %s36_s21, 128  ;;  %p2290_p8 = scmp.lt.s32.totalorder %s36_s21, %s36_s21 }
  0x60   :  { %p2286_p7 = scmp.ne.s32.totalorder %s36_s21, %s2285_s23  ;;  %p2291_p9 = scmp.lt.s32.totalorder %s2285_s23, %s2285_s23 }
  0x62   :  { %p2292_p10 = por %p2291_p9, %p2290_p8 }
  0x64   :  { %p2293_p11 = pnand %p2292_p10, %p2286_p7 }
  0x66   :  { %2296 = shalt.err (!%p2293_p11)
}
  0x67   :  { %41 = dma.hbm_to_vmem [thread:$0]  %s2864_s26, 128, %s36_s21, [#allocation3], %s2470_s28, %s2470_s28, %s2471_s20  }
  0x68   :  { %s2474_s24 = smov [#allocation7]   ;;  %s2475_s0 = smov [#allocation10]  }
  0x69   :  { %s59_s27 = sshll.u32 %s2474_s24, 4  ;;  %s85_s7 = sshll.u32 %s2475_s0, 4  ;;  %s60_s27 = int_to_ptr.vmem [resolvable:$true] %s59_s27  ;;  %s86_s7 = int_to_ptr.vmem [resolvable:$true] %s85_s7 }
  0x6a   :  { %s2297_s18 = scalar_lea.hbm %s2839_s2, 128 }
  0x6b   :  { %p2298_p12 = scmp.ne.s32.totalorder %s2839_s2, %s2297_s18  ;;  %p2301_p13 = scmp.lt.u32.totalorder %s2297_s18, %s2839_s2 }
  0x6d   :  { %p2303_p0 = pnand %p2301_p13, %p2298_p12 }
  0x6f   :  { %2306 = shalt.err (!%p2303_p0)
}
  0x70   :  { %s2307_s21 = scalar_lea.vmem %s60_s27, 128  ;;  %p2312_p2 = scmp.lt.s32.totalorder %s60_s27, %s60_s27 }
  0x71   :  { %p2308_p1 = scmp.ne.s32.totalorder %s60_s27, %s2307_s21  ;;  %p2313_p3 = scmp.lt.s32.totalorder %s2307_s21, %s2307_s21 }
  0x73   :  { %p2314_p4 = por %p2313_p3, %p2312_p2 }
  0x75   :  { %p2315_p5 = pnand %p2314_p4, %p2308_p1 }
  0x77   :  { %2318 = shalt.err (!%p2315_p5)
}
  0x78   :  { %65 = dma.hbm_to_vmem [thread:$0]  %s2839_s2, 128, %s60_s27, [#allocation6], %s2470_s28, %s2470_s28, %s2471_s20  }
  0x79   :  { %s2319_s11 = scalar_lea.hbm %s2842_s5, 6144 }
  0x7a   :  { %p2320_p6 = scmp.ne.s32.totalorder %s2842_s5, %s2319_s11  ;;  %p2323_p7 = scmp.lt.u32.totalorder %s2319_s11, %s2842_s5 }
  0x7c   :  { %p2325_p8 = pnand %p2323_p7, %p2320_p6 }
  0x7e   :  { %2328 = shalt.err (!%p2325_p8)
}
  0x7f   :  { %s2329_s30 = scalar_lea.vmem %s86_s7, 6144  ;;  %p2334_p10 = scmp.lt.s32.totalorder %s86_s7, %s86_s7 }
  0x80   :  { %p2330_p9 = scmp.ne.s32.totalorder %s86_s7, %s2329_s30  ;;  %p2335_p11 = scmp.lt.s32.totalorder %s2329_s30, %s2329_s30 }
  0x82   :  { %p2336_p12 = por %p2335_p11, %p2334_p10 }
  0x84   :  { %p2337_p13 = pnand %p2336_p12, %p2330_p9 }
  0x86   :  { %2340 = shalt.err (!%p2337_p13)
}
  0x87   :  { %91 = dma.hbm_to_vmem [thread:$0]  %s2842_s5, 6144, %s86_s7, [#allocation9], %s2470_s28, %s2470_s28, %s2471_s20  }
  0x88   :  { %s2476_s18 = smov [#allocation13]   ;;  %s2477_s19 = smov [#allocation16]  }
  0x89   :  { %s113_s3 = sshll.u32 %s2476_s18, 4  ;;  %s141_s25 = sshll.u32 %s2477_s19, 4  ;;  %s114_s3 = int_to_ptr.vmem [resolvable:$true] %s113_s3  ;;  %s142_s25 = int_to_ptr.vmem [resolvable:$true] %s141_s25 }
  0x8a   :  { %s2341_s26 = scalar_lea.hbm %s2846_s9, 3072 }
  0x8b   :  { %p2342_p0 = scmp.ne.s32.totalorder %s2846_s9, %s2341_s26  ;;  %p2345_p1 = scmp.lt.u32.totalorder %s2341_s26, %s2846_s9 }
  0x8d   :  { %p2347_p2 = pnand %p2345_p1, %p2342_p0 }
  0x8f   :  { %2350 = shalt.err (!%p2347_p2)
}
  0x90   :  { %s2351_s5 = scalar_lea.vmem %s114_s3, 3072  ;;  %p2356_p4 = scmp.lt.s32.totalorder %s114_s3, %s114_s3 }
  0x91   :  { %p2352_p3 = scmp.ne.s32.totalorder %s114_s3, %s2351_s5  ;;  %p2357_p5 = scmp.lt.s32.totalorder %s2351_s5, %s2351_s5 }
  0x93   :  { %p2358_p6 = por %p2357_p5, %p2356_p4 }
  0x95   :  { %p2359_p7 = pnand %p2358_p6, %p2352_p3 }
  0x97   :  { %2362 = shalt.err (!%p2359_p7)
}
  0x98   :  { %119 = dma.hbm_to_vmem [thread:$0]  %s2846_s9, 3072, %s114_s3, [#allocation12], %s2470_s28, %s2470_s28, %s2471_s20  }
  0x99   :  { %s2363_s29 = scalar_lea.hbm %s2850_s13, 1024 }
  0x9a   :  { %p2364_p8 = scmp.ne.s32.totalorder %s2850_s13, %s2363_s29  ;;  %p2367_p9 = scmp.lt.u32.totalorder %s2363_s29, %s2850_s13 }
  0x9c   :  { %p2369_p10 = pnand %p2367_p9, %p2364_p8 }
  0x9e   :  { %2372 = shalt.err (!%p2369_p10)
}
  0x9f   :  { %s2373_s19 = scalar_lea.vmem %s142_s25, 1024  ;;  %p2378_p12 = scmp.lt.s32.totalorder %s142_s25, %s142_s25 }
  0xa0   :  { %p2374_p11 = scmp.ne.s32.totalorder %s142_s25, %s2373_s19  ;;  %p2379_p13 = scmp.lt.s32.totalorder %s2373_s19, %s2373_s19 }
  0xa2   :  { %p2380_p0 = por %p2379_p13, %p2378_p12 }
  0xa4   :  { %p2381_p1 = pnand %p2380_p0, %p2374_p11 }
  0xa6   :  { %2384 = shalt.err (!%p2381_p1)
}
  0xa7   :  { %147 = dma.hbm_to_vmem [thread:$0]  %s2850_s13, 1024, %s142_s25, [#allocation15], %s2470_s28, %s2470_s28, %s2471_s20  }
  0xa8   :  { %2451 = dma.done.wait [#allocation3], 128  }
  0xa9   :  { %2452 = vsyncadd [#allocation3], 4294967168 }
  0xaa   :  { %2453 = dma.done.wait [#allocation6], 896  }
  0xab   :  { %2454 = vsyncadd [#allocation6], 4294966400 }
  0xac   :  { %2455 = dma.done.wait [#allocation9], 7168  }
  0xad   :  { %2456 = vsyncadd [#allocation9], 4294960128 }
  0xae   :  { %2457 = dma.done.wait [#allocation12], 4096  }
  0xaf   :  { %2458 = vsyncadd [#allocation12], 4294963200 }
  0xb0   :  { %2459 = dma.done.wait [#allocation15], 2048  }
  0xb1   :  { %2460 = vsyncadd [#allocation15], 4294965248  ;;  %v2478_v0 = vmov 0.0   ;;  %vm2479_vm0 = vmmov 0   ;;  %v2060_v1 = vld [vmem:[#allocation8] sm:$0xff]   ;;  %v2063_v4 = vld [vmem:[#allocation8 + $0x8] sm:$0xff]  }
  0xb2   :  { %1900 = vmatprep.subr.bf16.mxu0 %v2478_v0  ;;  %1916 = vmatprep.mubr.msk.bf16.mxu0 %vm2479_vm0, %v2478_v0  ;;  %v2061_v2 = vld [vmem:[#allocation10 + $0x40] sm:$0xff]   ;;  %v2064_v5 = vld [vmem:[#allocation10 + $0x48] sm:$0xff]   ;;  %v2066_v7 = vld [vmem:[#allocation8 + $0x10] sm:$0xff]  }
  0xb3   :  { %1901 = vmatpush3.bf16.msra.mxu0 %v2060_v1  ;;  %v2062_v3 = vld [vmem:[#allocation10] sm:$0xff]   ;;  %1780 = vmatprep.subr.bf16.mxu1 %v2061_v2  ;;  %v2065_v6 = vld [vmem:[#allocation10 + $0x8] sm:$0xff]   ;;  %v2067_v8 = vld [vmem:[#allocation10 + $0x50] sm:$0xff]  }
  0xb4   :  { %1902 = vmatprep.subr.bf16.mxu0 %v2478_v0  ;;  %1781 = vmatpush3.bf16.msra.mxu1 %v2062_v3  ;;  %v2068_v9 = vld [vmem:[#allocation10 + $0x10] sm:$0xff]   ;;  %v2069_v10 = vld [vmem:[#allocation8 + $0x18] sm:$0xff]   ;;  %v2073_v13 = vld [vmem:[#allocation10 + $0x60] sm:$0xff]  }
  0xb5   :  { %1782 = vmatprep.subr.bf16.mxu1 %v2064_v5  ;;  %v2070_v11 = vld [vmem:[#allocation10 + $0x58] sm:$0xff]   ;;  %v2072_v14 = vld [vmem:[#allocation8 + $0x20] sm:$0xff]   ;;  %v2076_v16 = vld [vmem:[#allocation10 + $0x68] sm:$0xff]  }
  0xb6   :  { %v2071_v12 = vld [vmem:[#allocation10 + $0x18] sm:$0xff]   ;;  %v2074_v15 = vld [vmem:[#allocation10 + $0x20] sm:$0xff]   ;;  %v2075_v17 = vld [vmem:[#allocation8 + $0x28] sm:$0xff]  }
  0xb7   :  { %1903 = vmatpush3.bf16.msra.mxu0 %v2063_v4  ;;  %v2077_v18 = vld [vmem:[#allocation10 + $0x28] sm:$0xff]   ;;  %v2079_v19 = vld [vmem:[#allocation10 + $0x70] sm:$0xff]   ;;  %v2081_v22 = vld [vmem:[#allocation8 + $0x38] sm:$0xff]  }
  0xb8   :  { %1904 = vmatprep.subr.bf16.mxu0 %v2478_v0  ;;  %1783 = vmatpush3.bf16.msra.mxu1 %v2065_v6  ;;  %v2078_v20 = vld [vmem:[#allocation8 + $0x30] sm:$0xff]   ;;  %v2082_v23 = vld [vmem:[#allocation10 + $0x78] sm:$0xff]   ;;  %v2087_v25 = vld [vmem:[#allocation5 + $0x4] ss:$24 sps:$4 sm:$0xff]  }
  0xb9   :  { %1784 = vmatprep.subr.bf16.mxu1 %v2067_v8  ;;  %v2080_v21 = vld [vmem:[#allocation10 + $0x30] sm:$0xff]   ;;  %v2083_v24 = vld [vmem:[#allocation10 + $0x38] sm:$0xff]   ;;  %v2088_v26 = vld [vmem:[#allocation10 + $0xc0] sm:$0xff]   ;;  %757 = vmatprep.mubr.bf16.mxu1 %v2087_v25 }
  0xba   :  { %v2084_v27 = vld [vmem:[#allocation2] sm:$0xff]   ;;  %v2092_v31 = vld [vmem:[#allocation10 + $0xc8] sm:$0xff]   ;;  %v2096_v35 = vld [vmem:[#allocation10 + $0xd0] sm:$0xff]  }
  0xbb   :  { %1905 = vmatpush3.bf16.msra.mxu0 %v2066_v7  ;;  %v2085_v28 = vld [vmem:[#allocation5] ss:$24 sps:$4 sm:$0xff]   ;;  %v2098_v37 = vld [vmem:[#allocation10 + $0x150] sm:$0xff]   ;;  %v2100_v39 = vld [vmem:[#allocation10 + $0xd8] sm:$0xff]  }
  0xbc   :  { %1906 = vmatprep.subr.bf16.mxu0 %v2478_v0  ;;  %1785 = vmatpush3.bf16.msra.mxu1 %v2068_v9  ;;  %v2090_v29 = vld [vmem:[#allocation10 + $0x140] sm:$0xff]   ;;  %v2094_v33 = vld [vmem:[#allocation10 + $0x148] sm:$0xff]   ;;  %v2097_v38 = vld [vmem:[#allocation10 + $0x90] sm:$0xff]  }
  0xbd   :  { %1786 = vmatprep.subr.bf16.mxu1 %v2070_v11  ;;  %v2089_v30 = vld [vmem:[#allocation10 + $0x80] sm:$0xff]   ;;  %v2093_v34 = vld [vmem:[#allocation10 + $0x88] sm:$0xff]   ;;  %v2099_v40 = vld [vmem:[#allocation10 + $0x110] sm:$0xff]  }
  0xbe   :  { %v2091_v32 = vld [vmem:[#allocation10 + $0x100] sm:$0xff]   ;;  %v2095_v36 = vld [vmem:[#allocation10 + $0x108] sm:$0xff]   ;;  %v2102_v41 = vld [vmem:[#allocation10 + $0x158] sm:$0xff]  }
  0xbf   :  { %1907 = vmatpush3.bf16.msra.mxu0 %v2069_v10  ;;  %v2101_v42 = vld [vmem:[#allocation10 + $0x98] sm:$0xff]   ;;  %v2104_v43 = vld [vmem:[#allocation10 + $0xe0] sm:$0xff]   ;;  %v2108_v47 = vld [vmem:[#allocation10 + $0xe8] sm:$0xff]  }
  0xc0   :  { %1908 = vmatprep.subr.bf16.mxu0 %v2478_v0  ;;  %1787 = vmatpush3.bf16.msra.mxu1 %v2071_v12  ;;  %v2103_v44 = vld [vmem:[#allocation10 + $0x118] sm:$0xff]   ;;  %v2106_v45 = vld [vmem:[#allocation10 + $0x160] sm:$0xff]   ;;  %v2110_v49 = vld [vmem:[#allocation10 + $0x168] sm:$0xff]  }
  0xc1   :  { %1788 = vmatprep.subr.bf16.mxu1 %v2073_v13  ;;  %v2105_v46 = vld [vmem:[#allocation10 + $0xa0] sm:$0xff]   ;;  %v2109_v50 = vld [vmem:[#allocation10 + $0xa8] sm:$0xff]   ;;  %v2112_v51 = vld [vmem:[#allocation10 + $0xf0] sm:$0xff]  }
  0xc2   :  { %v2107_v48 = vld [vmem:[#allocation10 + $0x120] sm:$0xff]   ;;  %v2111_v52 = vld [vmem:[#allocation10 + $0x128] sm:$0xff]   ;;  %v2114_v53 = vld [vmem:[#allocation10 + $0x170] sm:$0xff]  }
  0xc3   :  { %1909 = vmatpush3.bf16.msra.mxu0 %v2072_v14  ;;  %v2113_v54 = vld [vmem:[#allocation10 + $0xb0] sm:$0xff]   ;;  %v2116_v55 = vld [vmem:[#allocation10 + $0xf8] sm:$0xff]   ;;  %v2126_v63 = vld [vmem:[#allocation11] sm:$0xff]  }
  0xc4   :  { %1910 = vmatprep.subr.bf16.mxu0 %v2478_v0  ;;  %1789 = vmatpush3.bf16.msra.mxu1 %v2074_v15  ;;  %v2115_v56 = vld [vmem:[#allocation10 + $0x130] sm:$0xff]   ;;  %v2118_v57 = vld [vmem:[#allocation10 + $0x178] sm:$0xff]   ;;  %v2127_v2 = vld [vmem:[#allocation11 + $0x8] sm:$0xff]  }
  0xc5   :  { %1790 = vmatprep.subr.bf16.mxu1 %v2076_v16  ;;  %v2117_v58 = vld [vmem:[#allocation10 + $0xb8] sm:$0xff]   ;;  %v2122_v59 = vld [vmem:[#allocation5 + $0xc] ss:$24 sps:$4 sm:$0xff]   ;;  %v2120_v62 = vld [vmem:[#allocation5 + $0x8] ss:$24 sps:$4 sm:$0xff]  }
  0xc6   :  { %v2119_v60 = vld [vmem:[#allocation10 + $0x138] sm:$0xff]   ;;  %v2128_v3 = vld [vmem:[#allocation11 + $0x10] sm:$0xff]   ;;  %v2130_v5 = vld [vmem:[#allocation11 + $0x20] sm:$0xff]  }
  0xc7   :  { %1911 = vmatpush3.bf16.msra.mxu0 %v2075_v17  ;;  %v2125_v61 = vld [vmem:[#allocation5 + $0x14] ss:$24 sps:$4 sm:$0xff]   ;;  %v2123_v1 = vld [vmem:[#allocation5 + $0x10] ss:$24 sps:$4 sm:$0xff]   ;;  %v2131_v6 = vld [vmem:[#allocation11 + $0x28] sm:$0xff]  }
  0xc8   :  { %1912 = vmatprep.subr.bf16.mxu0 %v2478_v0  ;;  %1791 = vmatpush3.bf16.msra.mxu1 %v2077_v18  ;;  %v2129_v4 = vld [vmem:[#allocation11 + $0x18] sm:$0xff]   ;;  %v2132_v7 = vld [vmem:[#allocation11 + $0x30] sm:$0xff]   ;;  %v2135_v10 = vld [vmem:[#allocation13] sm:$0xff]  }
  0xc9   :  { %1792 = vmatprep.subr.bf16.mxu1 %v2079_v19  ;;  %v2133_v8 = vld [vmem:[#allocation11 + $0x38] sm:$0xff]   ;;  %v2136_v11 = vld [vmem:[#allocation13 + $0x8] sm:$0xff]   ;;  %v2137_v12 = vld [vmem:[#allocation13 + $0x10] sm:$0xff]  }
  0xca   :  { %v2134_v9 = vld [vmem:[#allocation7] sm:$0xff]   ;;  %v2139_v14 = vld [vmem:[#allocation13 + $0x20] sm:$0xff]   ;;  %v2140_v15 = vld [vmem:[#allocation13 + $0x28] sm:$0xff]  }
  0xcb   :  { %1913 = vmatpush3.bf16.msra.mxu0 %v2078_v20  ;;  %v2138_v13 = vld [vmem:[#allocation13 + $0x18] sm:$0xff]   ;;  %v2141_v16 = vld [vmem:[#allocation13 + $0x30] sm:$0xff]   ;;  %v2143_v18 = vld [vmem:[#allocation13 + $0x40] sm:$0xff]  }
  0xcc   :  { %1914 = vmatprep.subr.bf16.mxu0 %v2478_v0  ;;  %1793 = vmatpush3.bf16.msra.mxu1 %v2080_v21  ;;  %v2142_v17 = vld [vmem:[#allocation13 + $0x38] sm:$0xff]   ;;  %v2144_v19 = vld [vmem:[#allocation13 + $0x48] sm:$0xff]   ;;  %v2145_v20 = vld [vmem:[#allocation13 + $0x50] sm:$0xff]  }
  0xcd   :  { %1794 = vmatprep.subr.bf16.mxu1 %v2082_v23  ;;  %v2146_v21 = vld [vmem:[#allocation13 + $0x58] sm:$0xff]   ;;  %v2148_v23 = vld [vmem:[#allocation13 + $0x68] sm:$0xff]  }
  0xce   :  { %v2150_v25 = vld [vmem:[#allocation13 + $0x78] sm:$0xff]  }
  0xcf   :  { %1915 = vmatpush3.bf16.msra.mxu0 %v2081_v22  ;;  %v2147_v22 = vld [vmem:[#allocation13 + $0x60] sm:$0xff]  }
  0xd0   :  { %1802 = vmatprep.subr.bf16.mxu0 %v2088_v26  ;;  %1795 = vmatpush3.bf16.msra.mxu1 %v2083_v24  ;;  %v2149_v24 = vld [vmem:[#allocation13 + $0x70] sm:$0xff]   ;;  %v1635_v26 = vld [vmem:[%s2841_s4] ss:$0 sm:$0xff] }
  0xd1   :  { %1824 = vmatprep.subr.bf16.mxu1 %v2090_v29 }
  0xd2   :  { %1917 = vmatmul.mubr.bf16.vlgmr.msra.gmra.mrb[0].mxu0 %v2084_v27 }
  0xd3   :  { %1803 = vmatpush3.bf16.msra.mxu0 %v2089_v30  ;;  %758 = vmatmul.mubr.bf16.vlgmr.msra.gmra.mrb[0].mxu1 %v2085_v28 }
  0xd4   :  { %1804 = vmatprep.subr.bf16.mxu0 %v2092_v31  ;;  %1825 = vmatpush3.bf16.msra.mxu1 %v2091_v32 }
  0xd5   :  { %1826 = vmatprep.subr.bf16.mxu1 %v2094_v33  ;;  %798 = vmatprep.mubr.bf16.mxu0 %v2122_v59  ;;  %v2151_v59 = vld [vmem:[#allocation13 + $0x80] sm:$0xff]  }
  0xd6   :  { %839 = vmatprep.mubr.bf16.mxu1 %v2125_v61  ;;  %v2152_v61 = vld [vmem:[#allocation13 + $0x88] sm:$0xff]  }
  0xd7   :  { %1805 = vmatpush3.bf16.msra.mxu0 %v2093_v34 }
  0xd8   :  { %1806 = vmatprep.subr.bf16.mxu0 %v2096_v35  ;;  %1827 = vmatpush3.bf16.msra.mxu1 %v2095_v36 }
  0xd9   :  { %1828 = vmatprep.subr.bf16.mxu1 %v2098_v37 }
  0xdb   :  { %1807 = vmatpush3.bf16.msra.mxu0 %v2097_v38 }
  0xdc   :  { %1808 = vmatprep.subr.bf16.mxu0 %v2100_v39  ;;  %1829 = vmatpush3.bf16.msra.mxu1 %v2099_v40  ;;  %v1645_v40 = vld [vmem:[%s2843_s6] ss:$0 sm:$0xff] }
  0xdd   :  { %1830 = vmatprep.subr.bf16.mxu1 %v2102_v41 }
  0xdf   :  { %1809 = vmatpush3.bf16.msra.mxu0 %v2101_v42 }
  0xe0   :  { %1810 = vmatprep.subr.bf16.mxu0 %v2104_v43  ;;  %1831 = vmatpush3.bf16.msra.mxu1 %v2103_v44 }
  0xe1   :  { %1832 = vmatprep.subr.bf16.mxu1 %v2106_v45 }
  0xe3   :  { %1811 = vmatpush3.bf16.msra.mxu0 %v2105_v46 }
  0xe4   :  { %1812 = vmatprep.subr.bf16.mxu0 %v2108_v47  ;;  %1833 = vmatpush3.bf16.msra.mxu1 %v2107_v48 }
  0xe5   :  { %1834 = vmatprep.subr.bf16.mxu1 %v2110_v49 }
  0xe7   :  { %1813 = vmatpush3.bf16.msra.mxu0 %v2109_v50 }
  0xe8   :  { %1814 = vmatprep.subr.bf16.mxu0 %v2112_v51  ;;  %1835 = vmatpush3.bf16.msra.mxu1 %v2111_v52 }
  0xe9   :  { %1836 = vmatprep.subr.bf16.mxu1 %v2114_v53 }
  0xeb   :  { %1815 = vmatpush3.bf16.msra.mxu0 %v2113_v54 }
  0xec   :  { %1816 = vmatprep.subr.bf16.mxu0 %v2116_v55  ;;  %1837 = vmatpush3.bf16.msra.mxu1 %v2115_v56 }
  0xed   :  { %1838 = vmatprep.subr.bf16.mxu1 %v2118_v57 }
  0xef   :  { %1817 = vmatpush3.bf16.msra.mxu0 %v2117_v58 }
  0xf0   :  { %1920 = vmatprep.subr.bf16.mxu0 %v2478_v0  ;;  %1839 = vmatpush3.bf16.msra.mxu1 %v2119_v60 }
  0xf1   :  { %1940 = vmatprep.subr.bf16.mxu1 %v2478_v0 }
  0xf2   :  { %799 = vmatmul.mubr.bf16.vlgmr.msra.gmra.mrb[4].mxu0 %v2120_v62  ;;  %v2153_v62 = vld [vmem:[#allocation13 + $0x90] sm:$0xff]  }
  0xf3   :  { %1921 = vmatpush3.bf16.msra.mxu0 %v2126_v63  ;;  %1936 = vmatprep.mubr.msk.bf16.mxu0 %vm2479_vm0, %v2478_v0  ;;  %v2154_v63 = vld [vmem:[#allocation13 + $0x98] sm:$0xff]  }
  0xf4   :  { %840 = vmatmul.mubr.bf16.vlgmr.msra.gmra.mrb[4].mxu1 %v2123_v1  ;;  %1922 = vmatprep.subr.bf16.mxu0 %v2478_v0  ;;  %v2155_v1 = vld [vmem:[#allocation13 + $0xa0] sm:$0xff]  }
  0xf5   :  { %1956 = vmatprep.mubr.msk.bf16.mxu1 %vm2479_vm0, %v2478_v0  ;;  %1941 = vmatpush3.bf16.msra.mxu1 %v2143_v18  ;;  %v2164_v18 = vld [vmem:[#allocation14 + $0x28] sm:$0xff]  }
  0xf6   :  { %1942 = vmatprep.subr.bf16.mxu1 %v2478_v0 }
  0xf7   :  { %1923 = vmatpush3.bf16.msra.mxu0 %v2127_v2  ;;  %v2156_v2 = vld [vmem:[#allocation13 + $0xa8] sm:$0xff]  }
  0xf8   :  { %1924 = vmatprep.subr.bf16.mxu0 %v2478_v0 }
  0xf9   :  { %1943 = vmatpush3.bf16.msra.mxu1 %v2144_v19  ;;  %v2165_v19 = vld [vmem:[#allocation14 + $0x30] sm:$0xff]  }
  0xfa   :  { %1944 = vmatprep.subr.bf16.mxu1 %v2478_v0 }
  0xfb   :  { %1925 = vmatpush3.bf16.msra.mxu0 %v2128_v3  ;;  %v1700_v3 = vld [vmem:[%s2845_s8] ss:$0 sm:$0xff] }
  0xfc   :  { %1926 = vmatprep.subr.bf16.mxu0 %v2478_v0 }
  0xfd   :  { %1945 = vmatpush3.bf16.msra.mxu1 %v2145_v20  ;;  %v2166_v20 = vld [vmem:[#allocation14 + $0x38] sm:$0xff]  }
  0xfe   :  { %1946 = vmatprep.subr.bf16.mxu1 %v2478_v0 }
  0xff   :  { %1927 = vmatpush3.bf16.msra.mxu0 %v2129_v4 }
 0x100   :  { %1928 = vmatprep.subr.bf16.mxu0 %v2478_v0 }
 0x101   :  { %1947 = vmatpush3.bf16.msra.mxu1 %v2146_v21 }
 0x102   :  { %1948 = vmatprep.subr.bf16.mxu1 %v2478_v0 }
 0x103   :  { %1929 = vmatpush3.bf16.msra.mxu0 %v2130_v5 }
 0x104   :  { %1930 = vmatprep.subr.bf16.mxu0 %v2478_v0 }
 0x105   :  { %1949 = vmatpush3.bf16.msra.mxu1 %v2147_v22 }
 0x106   :  { %1950 = vmatprep.subr.bf16.mxu1 %v2478_v0 }
 0x107   :  { %1931 = vmatpush3.bf16.msra.mxu0 %v2131_v6 }
 0x108   :  { %1932 = vmatprep.subr.bf16.mxu0 %v2478_v0 }
 0x109   :  { %1951 = vmatpush3.bf16.msra.mxu1 %v2148_v23 }
 0x10a   :  { %1952 = vmatprep.subr.bf16.mxu1 %v2478_v0 }
 0x10b   :  { %1933 = vmatpush3.bf16.msra.mxu0 %v2132_v7  ;;  %v2157_v7 = vld [vmem:[#allocation13 + $0xb0] sm:$0xff]  }
 0x10c   :  { %1934 = vmatprep.subr.bf16.mxu0 %v2478_v0 }
 0x10d   :  { %1953 = vmatpush3.bf16.msra.mxu1 %v2149_v24 }
 0x10e   :  { %1954 = vmatprep.subr.bf16.mxu1 %v2478_v0 }
 0x10f   :  { %1935 = vmatpush3.bf16.msra.mxu0 %v2133_v8 }
 0x110   :  { %1960 = vmatprep.subr.bf16.mxu0 %v2478_v0 }
 0x111   :  { %1955 = vmatpush3.bf16.msra.mxu1 %v2150_v25 }
 0x112   :  { %1937 = vmatmul.mubr.bf16.vlgmr.msra.gmra.mrb[8].mxu0 %v2134_v9  ;;  %1980 = vmatprep.subr.bf16.mxu1 %v2478_v0 }
 0x113   :  { %1961 = vmatpush3.bf16.msra.mxu0 %v2135_v10  ;;  %1976 = vmatprep.mubr.msk.bf16.mxu0 %vm2479_vm0, %v2478_v0 }
 0x114   :  { %1962 = vmatprep.subr.bf16.mxu0 %v2478_v0 }
 0x117   :  { %1963 = vmatpush3.bf16.msra.mxu0 %v2136_v11 }
 0x118   :  { %1964 = vmatprep.subr.bf16.mxu0 %v2478_v0 }
 0x11b   :  { %1965 = vmatpush3.bf16.msra.mxu0 %v2137_v12  ;;  %v2158_v12 = vld [vmem:[#allocation13 + $0xb8] sm:$0xff]  }
 0x11c   :  { %1966 = vmatprep.subr.bf16.mxu0 %v2478_v0 }
 0x11f   :  { %1967 = vmatpush3.bf16.msra.mxu0 %v2138_v13  ;;  %v2159_v13 = vld [vmem:[#allocation14] sm:$0xff]  }
 0x120   :  { %1968 = vmatprep.subr.bf16.mxu0 %v2478_v0 }
 0x123   :  { %1969 = vmatpush3.bf16.msra.mxu0 %v2139_v14  ;;  %v2160_v14 = vld [vmem:[#allocation14 + $0x8] sm:$0xff]  }
 0x124   :  { %1970 = vmatprep.subr.bf16.mxu0 %v2478_v0 }
 0x127   :  { %1971 = vmatpush3.bf16.msra.mxu0 %v2140_v15  ;;  %v2161_v15 = vld [vmem:[#allocation14 + $0x10] sm:$0xff]  }
 0x128   :  { %1972 = vmatprep.subr.bf16.mxu0 %v2478_v0 }
 0x12b   :  { %1973 = vmatpush3.bf16.msra.mxu0 %v2141_v16  ;;  %v2162_v16 = vld [vmem:[#allocation14 + $0x18] sm:$0xff]  }
 0x12c   :  { %1974 = vmatprep.subr.bf16.mxu0 %v2478_v0 }
 0x12f   :  { %1975 = vmatpush3.bf16.msra.mxu0 %v2142_v17  ;;  %v2163_v17 = vld [vmem:[#allocation14 + $0x20] sm:$0xff]  }
 0x130   :  { %2000 = vmatprep.subr.bf16.mxu0 %v2478_v0 }
 0x1a5   :  { %v291_v27 = vpop.f32.mrb[0].mxu0 }
 0x1a6   :  { %v292_v28 = vadd.f32 %v1635_v26, %v291_v27  ;;  %v1918_v29 = vpop.f32.mrb[1].mxu0  ;;  %v1796_v30 = vpop.f32.mrb[0].mxu1 }
 0x1a7   :  { %v294_v31 = vpop.f32.mrb[2].mxu0  ;;  %v1797_v33 = vpop.f32.mrb[1].mxu1 }
 0x1a8   :  { %v295_v32 = vadd.f32 %v1635_v26, %v294_v31  ;;  %v1919_v34 = vpop.f32.mrb[3].mxu0  ;;  %v1798_v35 = vadd.f32 %v1797_v33, %v1796_v30  ;;  %v1799_v36 = vpop.f32.mrb[2].mxu1 }
 0x1a9   :  { %v1800_v38 = vpop.f32.mrb[3].mxu1 }
 0x1aa   :  { %v968_v37 = vpack.c.bf16 %v295_v32, %v292_v28  ;;  %v1801_v39 = vadd.f32 %v1800_v38, %v1799_v36  ;;  %v760_v43 = vadd.f32 %v1798_v35, %v1645_v40  ;;  %v1734_v32 = vld [vmem:[%s2847_s10] ss:$0 sm:$0xff] }
 0x1ac   :  { %1977 = vmatmul.mubr.bf16.vlgmr.msra.gmra.mrb[12].mxu0 %v968_v37  ;;  %v763_v49 = vadd.f32 %v1801_v39, %v1645_v40 }
 0x1ad   :  { %2016 = vmatprep.mubr.msk.bf16.mxu0 %vm2479_vm0, %v2478_v0  ;;  %2001 = vmatpush3.bf16.msra.mxu0 %v2159_v13 }
 0x1ae   :  { %2002 = vmatprep.subr.bf16.mxu0 %v2478_v0 }
 0x1b1   :  { %2003 = vmatpush3.bf16.msra.mxu0 %v2160_v14 }
 0x1b2   :  { %2004 = vmatprep.subr.bf16.mxu0 %v2478_v0 }
 0x1b5   :  { %2005 = vmatpush3.bf16.msra.mxu0 %v2161_v15 }
 0x1b6   :  { %2006 = vmatprep.subr.bf16.mxu0 %v2478_v0 }
 0x1b9   :  { %2007 = vmatpush3.bf16.msra.mxu0 %v2162_v16 }
 0x1ba   :  { %2008 = vmatprep.subr.bf16.mxu0 %v2478_v0 }
 0x1bd   :  { %2009 = vmatpush3.bf16.msra.mxu0 %v2163_v17 }
 0x1be   :  { %2010 = vmatprep.subr.bf16.mxu0 %v2478_v0 }
 0x1c1   :  { %2011 = vmatpush3.bf16.msra.mxu0 %v2164_v18 }
 0x1c2   :  { %2012 = vmatprep.subr.bf16.mxu0 %v2478_v0 }
 0x1c5   :  { %v1818_v41 = vpop.f32.mrb[4].mxu0  ;;  %2013 = vmatpush3.bf16.msra.mxu0 %v2165_v19 }
 0x1c6   :  { %v1819_v42 = vpop.f32.mrb[5].mxu0  ;;  %2014 = vmatprep.subr.bf16.mxu0 %v2478_v0 }
 0x1c7   :  { %v1820_v44 = vadd.f32 %v1819_v42, %v1818_v41  ;;  %v1840_v45 = vpop.f32.mrb[4].mxu1  ;;  %v1821_v46 = vpop.f32.mrb[6].mxu0 }
 0x1c8   :  { %v1841_v47 = vpop.f32.mrb[5].mxu1  ;;  %v1822_v48 = vpop.f32.mrb[7].mxu0 }
 0x1c9   :  { %v801_v50 = vadd.f32 %v1820_v44, %v760_v43  ;;  %v1842_v51 = vadd.f32 %v1841_v47, %v1840_v45  ;;  %v1823_v52 = vadd.f32 %v1822_v48, %v1821_v46  ;;  %v1843_v53 = vpop.f32.mrb[6].mxu1  ;;  %2015 = vmatpush3.bf16.msra.mxu0 %v2166_v20  ;;  %v2167_v43 = vld [vmem:[#allocation16] sm:$0xff]   ;;  %v2168_v44 = vld [vmem:[#allocation16 + $0x8] sm:$0xff]   ;;  %v2169_v45 = vld [vmem:[#allocation16 + $0x10] sm:$0xff]  }
 0x1ca   :  { %v1844_v54 = vpop.f32.mrb[7].mxu1  ;;  %v1735_v46 = vld [vmem:[%s2849_s12] ss:$0 sm:$0xff] }
 0x1cb   :  { %v842_v55 = vadd.f32 %v1842_v51, %v801_v50  ;;  %v804_v56 = vadd.f32 %v1823_v52, %v763_v49  ;;  %v1845_v57 = vadd.f32 %v1844_v54, %v1843_v53 }
 0x1cd   :  { %v845_v58 = vadd.f32 %v1845_v57, %v804_v56  ;;  %v2170_v57 = vld [vmem:[#allocation16 + $0x18] sm:$0xff]  }
 0x1cf   :  { %v985_v60 = vpack.c.bf16 %v845_v58, %v842_v55  ;;  %v2171_v58 = vld [vmem:[#allocation16 + $0x20] sm:$0xff]  }
 0x1d1   :  { %1957 = vmatmul.mubr.bf16.vlgmr.msra.gmra.mrb[8].mxu1 %v985_v60  ;;  %v2173_v60 = vld [vmem:[#allocation16 + $0x30] sm:$0xff]  }
 0x1d2   :  { %1981 = vmatpush3.bf16.msra.mxu1 %v2151_v59  ;;  %1996 = vmatprep.mubr.msk.bf16.mxu1 %vm2479_vm0, %v2478_v0  ;;  %v2172_v59 = vld [vmem:[#allocation16 + $0x28] sm:$0xff]  }
 0x1d3   :  { %1982 = vmatprep.subr.bf16.mxu1 %v2478_v0 }
 0x1d6   :  { %1983 = vmatpush3.bf16.msra.mxu1 %v2152_v61  ;;  %v2174_v61 = vld [vmem:[#allocation16 + $0x38] sm:$0xff]  }
 0x1d7   :  { %1984 = vmatprep.subr.bf16.mxu1 %v2478_v0 }
 0x1da   :  { %1985 = vmatpush3.bf16.msra.mxu1 %v2153_v62 }
 0x1db   :  { %1986 = vmatprep.subr.bf16.mxu1 %v2478_v0 }
 0x1de   :  { %1987 = vmatpush3.bf16.msra.mxu1 %v2154_v63 }
 0x1df   :  { %1988 = vmatprep.subr.bf16.mxu1 %v2478_v0 }
 0x1e2   :  { %1989 = vmatpush3.bf16.msra.mxu1 %v2155_v1 }
 0x1e3   :  { %1990 = vmatprep.subr.bf16.mxu1 %v2478_v0 }
 0x1e5   :  { %v961_v4 = vpop.f32.mrb[8].mxu0 }
 0x1e6   :  { %1991 = vmatpush3.bf16.msra.mxu1 %v2156_v2  ;;  %v962_v5 = vadd.f32 %v1700_v3, %v961_v4  ;;  %v1938_v6 = vpop.f32.mrb[9].mxu0 }
 0x1e7   :  { %v964_v8 = vpop.f32.mrb[10].mxu0  ;;  %1992 = vmatprep.subr.bf16.mxu1 %v2478_v0 }
 0x1e8   :  { %v965_v9 = vadd.f32 %v1700_v3, %v964_v8  ;;  %v1939_v10 = vpop.f32.mrb[11].mxu0  ;;  %v1539_v8 = vlaneseq }
 0x1ea   :  { %v1180_v11 = vpack.c.bf16 %v965_v9, %v962_v5  ;;  %1993 = vmatpush3.bf16.msra.mxu1 %v2157_v7  ;;  %v1540_v9 = vand.u32 127, %v1539_v8 }
 0x1eb   :  { %1994 = vmatprep.subr.bf16.mxu1 %v2478_v0 }
 0x1ec   :  { %vm1541_vm1 = vcmp.lt.s32.totalorder %v1540_v9, 7 }
 0x1ee   :  { %1995 = vmatpush3.bf16.msra.mxu1 %v2158_v12 }
 0x1ef   :  { %2020 = vmatprep.subr.bf16.mxu1 %v2478_v0 }
 0x1f1   :  { %1997 = vmatmul.mubr.bf16.vlgmr.msra.gmra.mrb[12].mxu1 %v1180_v11 }
 0x1f2   :  { %2036 = vmatprep.mubr.msk.bf16.mxu1 %vm2479_vm0, %v2478_v0  ;;  %2021 = vmatpush3.bf16.msra.mxu1 %v2167_v43 }
 0x1f3   :  { %2022 = vmatprep.subr.bf16.mxu1 %v2478_v0 }
 0x1f6   :  { %2023 = vmatpush3.bf16.msra.mxu1 %v2168_v44 }
 0x1f7   :  { %2024 = vmatprep.subr.bf16.mxu1 %v2478_v0 }
 0x1fa   :  { %2025 = vmatpush3.bf16.msra.mxu1 %v2169_v45 }
 0x1fb   :  { %2026 = vmatprep.subr.bf16.mxu1 %v2478_v0 }
 0x1fe   :  { %2027 = vmatpush3.bf16.msra.mxu1 %v2170_v57 }
 0x1ff   :  { %2028 = vmatprep.subr.bf16.mxu1 %v2478_v0 }
 0x202   :  { %2029 = vmatpush3.bf16.msra.mxu1 %v2171_v58 }
 0x203   :  { %2030 = vmatprep.subr.bf16.mxu1 %v2478_v0 }
 0x206   :  { %2031 = vmatpush3.bf16.msra.mxu1 %v2172_v59 }
 0x207   :  { %2032 = vmatprep.subr.bf16.mxu1 %v2478_v0 }
 0x20a   :  { %2033 = vmatpush3.bf16.msra.mxu1 %v2173_v60 }
 0x20b   :  { %2034 = vmatprep.subr.bf16.mxu1 %v2478_v0  ;;  %v1744_v0 = vld [vmem:[%s2851_s14] ss:$0 sm:$0xff]  ;;  %s2480_s14 = smov [#allocation18]  }
 0x20c   :  { %s1600_s23 = sshll.u32 %s2480_s14, 4  ;;  %s1601_s23 = int_to_ptr.vmem [resolvable:$true] %s1600_s23 }
 0x20d   :  { %s2385_s11 = scalar_lea.vmem %s1601_s23, 128  ;;  %p2390_p3 = scmp.lt.s32.totalorder %s1601_s23, %s1601_s23 }
 0x20e   :  { %2035 = vmatpush3.bf16.msra.mxu1 %v2174_v61  ;;  %p2386_p2 = scmp.ne.s32.totalorder %s1601_s23, %s2385_s11  ;;  %p2391_p4 = scmp.lt.s32.totalorder %s2385_s11, %s2385_s11 }
 0x210   :  { %p2392_p5 = por %p2391_p4, %p2390_p3 }
 0x212   :  { %p2393_p6 = pnand %p2392_p5, %p2386_p2 }
 0x27f   :  { %v1173_v21 = vpop.f32.mrb[12].mxu0 }
 0x280   :  { %v1978_v22 = vpop.f32.mrb[13].mxu0 }
 0x281   :  { %v1176_v23 = vpop.f32.mrb[14].mxu0 }
 0x282   :  { %v1979_v24 = vpop.f32.mrb[15].mxu0 }
 0x2a4   :  { %v1084_v25 = vpop.f32.mrb[8].mxu1 }
 0x2a5   :  { %v1174_v26 = vadd.f32 %v1173_v21, %v1084_v25  ;;  %v1958_v27 = vpop.f32.mrb[9].mxu1 }
 0x2a6   :  { %v1087_v28 = vpop.f32.mrb[10].mxu1 }
 0x2a7   :  { %v1177_v29 = vadd.f32 %v1176_v23, %v1087_v28  ;;  %v1959_v30 = vpop.f32.mrb[11].mxu1 }
 0x2c4   :  { %v1279_v31 = vpop.f32.mrb[12].mxu1 }
 0x2c5   :  { %v1286_v33 = vadd.f32 %v1279_v31, %v1174_v26  ;;  %v1998_v34 = vpop.f32.mrb[13].mxu1 }
 0x2c6   :  { %v1282_v35 = vpop.f32.mrb[14].mxu1 }
 0x2c7   :  { %v1295_v36 = vadd.f32 %v1734_v32, %v1286_v33  ;;  %v1287_v37 = vadd.f32 %v1282_v35, %v1177_v29  ;;  %v1999_v38 = vpop.f32.mrb[15].mxu1 }
 0x2c9   :  { %v1296_v39 = vadd.f32 %v1734_v32, %v1287_v37  ;;  %v1297_v40 = vmax.f32 %v1295_v36, 0.0 }
 0x2cb   :  { %v1298_v41 = vmax.f32 %v1296_v39, 0.0 }
 0x2cd   :  { %v1299_v42 = vpack.c.bf16 %v1298_v41, %v1297_v40 }
 0x2cf   :  { %2017 = vmatmul.mubr.bf16.vlgmr.msra.gmra.mrb[16].mxu0 %v1299_v42 }
 0x3a2   :  { %v1405_v47 = vpop.f32.mrb[16].mxu0 }
 0x3a3   :  { %v1406_v48 = vadd.f32 %v1735_v46, %v1405_v47  ;;  %v2018_v49 = vpop.f32.mrb[17].mxu0 }
 0x3a4   :  { %v1408_v50 = vpop.f32.mrb[18].mxu0 }
 0x3a5   :  { %v1412_v51 = vmax.f32 %v1406_v48, 0.0  ;;  %v1409_v52 = vadd.f32 %v1735_v46, %v1408_v50  ;;  %v2019_v53 = vpop.f32.mrb[19].mxu0 }
 0x3a7   :  { %v1413_v54 = vmax.f32 %v1409_v52, 0.0  ;;  %v1414_v55 = vmul.f32 %v1412_v51, %v1412_v51 }
 0x3a9   :  { %1416 = vadd.xlane.f32.xlu0 %v1414_v55  ;;  %v1415_v56 = vmul.f32 %v1413_v54, %v1413_v54 }
 0x3ad   :  { %1418 = vadd.xlane.f32.xlu0 %v1415_v56 }
 0x436   :  { %v1417_v62 = vpop.xlane.xlu0 %1416 }
 0x437   :  { %v1420_v63 = vmax.f32 %v1417_v62, 1e-24 }
 0x439   :  { %2175 = vrsqrt.f32 %v1420_v63 }
 0x43a   :  { %v1419_v1 = vpop.xlane.xlu0 %1418 }
 0x43b   :  { %v1421_v2 = vmax.f32 %v1419_v1, 1e-24 }
 0x43d   :  { %2177 = vrsqrt.f32 %v1421_v2 }
 0x443   :  { %v2176_v3 = vpop.eup %2175 }
 0x444   :  { %v1424_v5 = vmul.f32 %v2176_v3, %v1412_v51 }
 0x447   :  { %v2178_v4 = vpop.eup %2177 }
 0x448   :  { %v1425_v6 = vmul.f32 %v2178_v4, %v1413_v54 }
 0x44a   :  { %v1426_v7 = vpack.c.bf16 %v1425_v6, %v1424_v5 }
 0x44c   :  { %2037 = vmatmul.mubr.bf16.vlgmr.msra.gmra.mrb[16].mxu1 %v1426_v7  ;;  %1770 = vst [vmem:[#allocation20] sm:$0xff] %v1426_v7  }
 0x51f   :  { %v1532_v10 = vpop.f32.mrb[16].mxu1 }
 0x520   :  { %v1533_v11 = vadd.f32 %v1744_v0, %v1532_v10  ;;  %v2038_v12 = vpop.f32.mrb[17].mxu1 }
 0x521   :  { %v1535_v13 = vpop.f32.mrb[18].mxu1 }
 0x522   :  { %v1536_v14 = vadd.f32 %v1744_v0, %v1535_v13  ;;  %v2039_v15 = vpop.f32.mrb[19].mxu1  ;;  %v1542_v16 = vsel %vm1541_vm1, %v1533_v11, -1e+30 }
 0x523   :  { %1544 = vmax.xlane.f32.xlu1 %v1542_v16 }
 0x524   :  { %v1764_v17 = vpack.c.bf16 %v1536_v14, %v1533_v11  ;;  %v1543_v18 = vsel %vm1541_vm1, %v1536_v14, -1e+30 }
 0x526   :  { %1765 = vst [vmem:[#allocation18] sm:$0xff] %v1764_v17  }
 0x527   :  { %1546 = vmax.xlane.f32.xlu1 %v1543_v18 }
 0x5b0   :  { %v1545_v19 = vpop.xlane.xlu1 %1544 }
 0x5b1   :  { %v1548_v20 = vsub.f32 %v1542_v16, %v1545_v19 }
 0x5b3   :  { %v1550_v21 = vmul.f32 1.442695, %v1548_v20 }
 0x5b4   :  { %v1547_v22 = vpop.xlane.xlu1 %1546 }
 0x5b5   :  { %2179 = vpow2.f32 %v1550_v21  ;;  %v1549_v23 = vsub.f32 %v1543_v18, %v1547_v22 }
 0x5b7   :  { %v1552_v24 = vmul.f32 1.442695, %v1549_v23 }
 0x5b9   :  { %2181 = vpow2.f32 %v1552_v24 }
 0x5bf   :  { %v2180_v25 = vpop.eup %2179 }
 0x5c0   :  { %1554 = vadd.xlane.f32.xlu0 %v2180_v25 }
 0x5c3   :  { %v2182_v26 = vpop.eup %2181 }
 0x5c4   :  { %1556 = vadd.xlane.f32.xlu1 %v2182_v26 }
 0x5c5   :  { %2396 = shalt.err (!%p2393_p6)
}
 0x5c6   :  { %s2397_s1 = scalar_lea.hbm %s2853_s16, 128 }
 0x5c7   :  { %p2398_p7 = scmp.ne.s32.totalorder %s2853_s16, %s2397_s1  ;;  %p2401_p8 = scmp.lt.u32.totalorder %s2397_s1, %s2853_s16 }
 0x5c9   :  { %p2403_p9 = pnand %p2401_p8, %p2398_p7 }
 0x5cb   :  { %2406 = shalt.err (!%p2403_p9)
}
 0x5cc   :  { %1606 = dma.vmem_to_hbm [thread:$0]  %s1601_s23, 128, %s2853_s16, [#allocation19], %s2470_s28, %s2470_s28, %s2471_s20  }
 0x5cd   :  { %s2481_s18 = smov [#allocation20]  }
 0x5ce   :  { %s1612_s19 = sshll.u32 %s2481_s18, 4  ;;  %s1613_s19 = int_to_ptr.vmem [resolvable:$true] %s1612_s19 }
 0x5cf   :  { %s2407_s9 = scalar_lea.vmem %s1613_s19, 128  ;;  %p2412_p11 = scmp.lt.s32.totalorder %s1613_s19, %s1613_s19 }
 0x5d0   :  { %p2408_p10 = scmp.ne.s32.totalorder %s1613_s19, %s2407_s9  ;;  %p2413_p12 = scmp.lt.s32.totalorder %s2407_s9, %s2407_s9 }
 0x5d2   :  { %p2414_p13 = por %p2413_p12, %p2412_p11 }
 0x5d4   :  { %p2415_p0 = pnand %p2414_p13, %p2408_p10 }
 0x5d6   :  { %2418 = shalt.err (!%p2415_p0)
}
 0x5d7   :  { %s2865_s25 = sld [smem:[#allocation31_spill]] }
 0x5dd   :  { %s2419_s22 = scalar_lea.hbm %s2865_s25, 128 }
 0x5de   :  { %p2420_p1 = scmp.ne.s32.totalorder %s2865_s25, %s2419_s22  ;;  %p2423_p2 = scmp.lt.u32.totalorder %s2419_s22, %s2865_s25 }
 0x5e0   :  { %p2425_p3 = pnand %p2423_p2, %p2420_p1 }
 0x5e2   :  { %2428 = shalt.err (!%p2425_p3)
}
 0x5e3   :  { %1618 = dma.vmem_to_hbm [thread:$0]  %s1613_s19, 128, %s2865_s25, [#allocation19], %s2470_s28, %s2470_s28, %s2471_s20  }
 0x5e4   :  { %s2482_s10 = smov [#allocation17]  }
 0x5e5   :  { %s1588_s15 = sshll.u32 %s2482_s10, 4  ;;  %s1589_s15 = int_to_ptr.vmem [resolvable:$true] %s1588_s15 }
 0x5e6   :  { %s2429_s12 = scalar_lea.vmem %s1589_s15, 256  ;;  %p2434_p5 = scmp.lt.s32.totalorder %s1589_s15, %s1589_s15 }
 0x5e7   :  { %p2430_p4 = scmp.ne.s32.totalorder %s1589_s15, %s2429_s12  ;;  %p2435_p6 = scmp.lt.s32.totalorder %s2429_s12, %s2429_s12 }
 0x5e9   :  { %p2436_p7 = por %p2435_p6, %p2434_p5 }
 0x5eb   :  { %p2437_p8 = pnand %p2436_p7, %p2430_p4 }
 0x64d   :  { %v1555_v27 = vpop.xlane.xlu0 %1554 }
 0x64e   :  { %2183 = vrcp.f32 %v1555_v27 }
 0x651   :  { %v1557_v28 = vpop.xlane.xlu1 %1556 }
 0x652   :  { %2185 = vrcp.f32 %v1557_v28 }
 0x658   :  { %v2184_v29 = vpop.eup %2183 }
 0x659   :  { %v1560_v30 = vmul.f32 %v2184_v29, %v2180_v25 }
 0x65b   :  { %1562 = vst [vmem:[#allocation17] sm:$0xff] %v1560_v30 }
 0x65c   :  { %v2186_v31 = vpop.eup %2185 }
 0x65d   :  { %v1561_v32 = vmul.f32 %v2186_v31, %v2182_v26 }
 0x65f   :  { %1563 = vst [vmem:[#allocation17 + $0x8] sm:$0xff] %v1561_v32 }
 0x660   :  { %2440 = shalt.err (!%p2437_p8)
}
 0x661   :  { %s2866_s17 = sld [smem:[#allocation30_spill]] }
 0x667   :  { %s2441_s14 = scalar_lea.hbm %s2866_s17, 256 }
 0x668   :  { %p2442_p9 = scmp.ne.s32.totalorder %s2866_s17, %s2441_s14  ;;  %p2445_p10 = scmp.lt.u32.totalorder %s2441_s14, %s2866_s17 }
 0x66a   :  { %p2447_p11 = pnand %p2445_p10, %p2442_p9 }
 0x66c   :  { %2450 = shalt.err (!%p2447_p11)
}
 0x66d   :  { %s2483_s1 = smov 128   ;;  %s2484_s24 = smov 8  }
 0x66e   :  { %1594 = dma.vmem_to_hbm [thread:$0]  %s1589_s15, 256, %s2866_s17, [#allocation4], %s2483_s1, %s2483_s1, %s2484_s24  }
 0x66f   :  { %2461 = dma.done.wait [#allocation4], 256  }
 0x670   :  { %2462 = vsyncadd [#allocation4], 4294967040 }
 0x671   :  { %2463 = dma.done.wait [#allocation19], 256  }
 0x672   :  { %2464 = vsyncadd [#allocation19], 4294967040 }
 0x673   :  { %1628 = vsyncpa [#allocation3], 1 }
 0x674   :  { %1629 = vsyncpa [#allocation6], 1 }
 0x675   :  { %1630 = vsyncpa [#allocation9], 1 }
 0x676   :  { %1631 = vsyncpa [#allocation12], 1 }
 0x677   :  { %1632 = vsyncpa [#allocation15], 1 }
 0x678   :  { %1633 = vsyncpa [#allocation4], 1 }
 0x679   :  { %1634 = vsyncpa [#allocation19], 1 }

</bundles_post_ra>
